<compile_context>
chip_gen: v7x
topology: tpu7x:2x2x1
jax: 0.10.0
libtpu: 0.0.40
codegen_flags: <defaults>
</compile_context>

<pallas_src>
import functools

import jax
import jax.numpy as jnp
from jax.experimental import pallas as pl
from jax.experimental.pallas import tpu as pltpu

_PI = 3.14159265358979323846
_TORCH_PI = 3.141549  # (sic) the constant used by the reference PyTorch code


# ---------------------------------------------------------------------------
# float32-accurate arccos built only from mul/add/sqrt/select (Cephes asinf).
# TODO(synk): replace with native jnp.arccos if/when lax.acos_p gets a Mosaic lowering.
# ---------------------------------------------------------------------------
def _asin_poly(x):
  """Cephes asinf polynomial, valid for |x| <= 0.5."""
  z = x * x
  p = 4.2163199048e-2
  p = p * z + 2.4181311049e-2
  p = p * z + 4.5470025998e-2
  p = p * z + 7.4953002686e-2
  p = p * z + 1.6666752422e-1
  return x + x * z * p


def _acos(x):
  """arccos(x) for x in (-1, 1), ~1-2 ulp float32 accuracy."""
  ax = jnp.abs(x)
  big = ax > 0.5
  s = jnp.sqrt(jnp.maximum(0.5 * (1.0 - ax), 0.0))
  a_big = 2.0 * _asin_poly(s)                       # acos(|x|) for |x| > 0.5
  a_big = jnp.where(x > 0.0, a_big, _PI - a_big)    # reflect for x < -0.5
  a_small = 0.5 * _PI - _asin_poly(x)               # |x| <= 0.5
  return jnp.where(big, a_big, a_small)


# ---------------------------------------------------------------------------
# Pallas kernel: one batch element per grid step.
# ---------------------------------------------------------------------------
def _omni_loss_kernel(pred_ref, dt_ref, ft0_ref, ft1_ref, bt_ref, w_ref,
                      out_ref, *, H, W):
  f32 = jnp.float32
  fp0 = pred_ref[0, 0].astype(f32)   # flow x prediction
  fp1 = pred_ref[0, 1].astype(f32)   # flow y prediction
  dp = pred_ref[0, 2].astype(f32)    # dist prediction
  bp = pred_ref[0, 3].astype(f32)    # boundary logits prediction

  dt = dt_ref[0, 0].astype(f32)      # dist target
  ft0 = ft0_ref[0, 0].astype(f32)    # flow x target
  ft1 = ft1_ref[0, 0].astype(f32)    # flow y target
  bt = bt_ref[0, 0].astype(f32)      # boundary target
  w = w_ref[0, 0].astype(f32)        # weights target

  mask = (dt > 0.0).astype(f32)      # cellmask
  mw = mask * w                      # hoisted: reused by s2/s3/s5/s7

  # ---- boundary-validity masks for zero-padded shifts: built ONCE, reused. ----
  ii = jax.lax.broadcasted_iota(jnp.int32, (H, W), 0)
  jj = jax.lax.broadcasted_iota(jnp.int32, (H, W), 1)
  row_up_ok = (ii >= 1).astype(f32)        # y[i,j] = x[i-1,j] valid
  row_dn_ok = (ii <= H - 2).astype(f32)    # y[i,j] = x[i+1,j] valid
  col_lf_ok = (jj >= 1).astype(f32)        # y[i,j] = x[i,j-1] valid
  col_rt_ok = (jj <= W - 2).astype(f32)    # y[i,j] = x[i,j+1] valid

  def shift_up(x):     # y[i,j] = x[i-1,j], zero-padded
    return pltpu.roll(x, shift=1, axis=0) * row_up_ok

  def shift_down(x):   # y[i,j] = x[i+1,j]
    return pltpu.roll(x, shift=H - 1, axis=0) * row_dn_ok

  def shift_left(x):   # y[i,j] = x[i,j-1]
    return pltpu.roll(x, shift=1, axis=1) * col_lf_ok

  def shift_right(x):  # y[i,j] = x[i,j+1]
    return pltpu.roll(x, shift=W - 1, axis=1) * col_rt_ok

  def sobel(x):
    """Separable zero-padded 3x3 Sobel (cross-correlation): 2 sublane + 4 lane rolls."""
    up, dn = shift_up(x), shift_down(x)
    sm = up + 2.0 * x + dn                              # vertical [1,2,1]
    sd = dn - up                                        # vertical [-1,0,1]
    gx = shift_right(sm) - shift_left(sm)               # horizontal [-1,0,1]
    gy = shift_left(sd) + 2.0 * sd + shift_right(sd)    # horizontal [1,2,1]
    return gx, gy

  # Difference images (Sobel is linear: sobel(p) - sobel(t) == sobel(p - t)).
  d0 = fp0 - ft0
  d1 = fp1 - ft1
  dd = dp - dt

  # loss1 term: weighted MSE on flows (1/25 folded into wrapper)
  s1 = w * (d0 * d0 + d1 * d1)

  # loss2 term: ArcCosDotLoss (masked, 1/pi^2 folded into wrapper)
  pred_norm = jnp.sqrt(fp0 * fp0 + fp1 * fp1)
  tgt_norm = jnp.sqrt(ft0 * ft0 + ft1 * ft1)
  denom = pred_norm * tgt_norm + 1e-12
  dot = fp0 * ft0 + fp1 * ft1
  ratio = jnp.clip(dot * pl.reciprocal(denom, approx=True), -0.999999, 0.999999)
  ac = _acos(ratio)
  s2 = mw * (ac * ac)

  # loss3 term: DerivativeLoss on flows (masked, 1/25 folded into wrapper)
  g0x, g0y = sobel(d0)
  g1x, g1y = sobel(d1)
  s3 = mw * (g0x * g0x + g0y * g0y + g1x * g1x + g1y * g1y)

  # loss4 term: BCEWithLogits on boundary (unreduced)
  s4 = jnp.maximum(bp, 0.0) - bp * bt + jnp.log1p(jnp.exp(-jnp.abs(bp)))

  # loss5 term: NormLoss (masked, 1/25 folded into wrapper)
  nd = pred_norm - tgt_norm
  s5 = mw * (nd * nd)

  # loss6 term: weighted MSE on dist (1/25 folded into wrapper)
  s6 = w * (dd * dd)

  # loss7 term: DerivativeLoss on dist (masked, 1/25 folded into wrapper)
  gdx, gdy = sobel(dd)
  s7 = mw * (gdx * gdx + gdy * gdy)

  # ---- pack the 8 per-batch partial sums into one (1, 8) row (single output) ----
  vals = (s1, s2, s3, s4, s5, s6, s7, mask)
  idx = jax.lax.broadcasted_iota(jnp.int32, (1, 8), 1)
  row = jnp.zeros((1, 8), f32)
  for i, v in enumerate(vals):
    row = row + (idx == i).astype(f32) * jnp.sum(v, keepdims=True)
  out_ref[0] = row


def omni_loss(prediction, target):
  """Pallas implementation of OmniLoss.forward (NCHW)."""
  B, Cp, H, W = prediction.shape
  Bt, Ct, Ht, Wt = target.shape
  assert (B, H, W) == (Bt, Ht, Wt) and Cp >= 4 and Ct >= 8

  kernel = functools.partial(_omni_loss_kernel, H=H, W=W)

  # Only the used target channels (1,2,3,5,7) are DMA'd: per-channel BlockSpecs
  # over the same target array (no wrapper-side slicing / extra HBM copies).
  def _tgt_spec(ch):
    return pl.BlockSpec((1, 1, H, W), lambda b, _c=ch: (b, _c, 0, 0))

  # TODO(synk): for very large images on v7x (64 MiB VMEM), add an H-strip grid
  # dimension with a 1-row halo and an explicit vmem_limit_bytes.
  sums = pl.pallas_call(
      kernel,
      grid=(B,),
      in_specs=[
          pl.BlockSpec((1, Cp, H, W), lambda b: (b, 0, 0, 0)),
          _tgt_spec(1),   # dist target
          _tgt_spec(2),   # flow x target
          _tgt_spec(3),   # flow y target
          _tgt_spec(5),   # boundary target
          _tgt_spec(7),   # weights target
      ],
      out_specs=pl.BlockSpec((1, 1, 8), lambda b: (b, 0, 0)),
      out_shape=jax.ShapeDtypeStruct((B, 1, 8), jnp.float32),
      compiler_params=pltpu.CompilerParams(dimension_semantics=("parallel",)),
  )(prediction, target, target, target, target, target)

  t = jnp.sum(sums, axis=(0, 1))      # (8,) totals over the batch
  s1, s2, s3, s4, s5, s6, s7, cnt = (t[i] for i in range(8))
  n = jnp.float32(B * H * W)

  loss1 = 10.0 * s1 / (25.0 * 2.0 * n)           # WeightedMSE over (B,2,H,W)
  loss2 = s2 / (_TORCH_PI * _TORCH_PI * cnt)     # masked mean over (B,H,W)
  loss3 = s3 / (25.0 * 2.0 * cnt) / 10.0         # masked mean over (B,2,H,W)
  loss4 = 2.0 * s4 / n                           # BCEWithLogits mean
  loss5 = 2.0 * s5 / (25.0 * cnt)                # masked mean
  loss6 = 2.0 * s6 / (25.0 * n)                  # WeightedMSE over (B,H,W)
  loss7 = s7 / (25.0 * cnt) / 10.0               # masked mean
  return loss1 + loss2 + loss3 + loss4 + loss5 + loss6 + loss7


# ---------------------------------------------------------------------------
# Pure-JAX reference (mirrors the PyTorch module) used as a sanity check.
# ---------------------------------------------------------------------------
def _sobel_ref(x):
  H, W = x.shape[-2], x.shape[-1]
  xp = jnp.pad(x, ((0, 0), (0, 0), (1, 1), (1, 1)))

  def sh(di, dj):
    return xp[:, :, 1 + di:1 + di + H, 1 + dj:1 + dj + W]

  gx = (-sh(-1, -1) + sh(-1, 1) - 2 * sh(0, -1) + 2 * sh(0, 1)
        - sh(1, -1) + sh(1, 1))
  gy = (-sh(-1, -1) - 2 * sh(-1, 0) - sh(-1, 1)
        + sh(1, -1) + 2 * sh(1, 0) + sh(1, 1))
  return gx, gy


def omni_loss_ref(prediction, target):
  flows_t = target[:, 2:4]
  dist_t = target[:, 1]
  boundary_t = target[:, 5]
  cellmask = (dist_t > 0).astype(jnp.float32)
  w = target[:, 7]
  flows_p = prediction[:, :2]
  boundary_p = prediction[:, 3]
  dist_p = prediction[:, 2]
  w2 = jnp.stack([w, w], axis=1)
  m2 = jnp.stack([cellmask, cellmask], axis=1)

  def wmse(p, t, wt):
    return jnp.mean(jnp.square((p - t) / 5.0) * wt)

  def masked_mean(v, m):
    return jnp.sum(v * m) / jnp.sum(m)

  loss1 = 10.0 * wmse(flows_p, flows_t, w2)

  denom = (jnp.linalg.norm(flows_p, axis=1) * jnp.linalg.norm(flows_t, axis=1) + 1e-12)
  dot = flows_p[:, 0] * flows_t[:, 0] + flows_p[:, 1] * flows_t[:, 1]
  pd = jnp.arccos(jnp.clip(dot / denom, -0.999999, 0.999999)) / _TORCH_PI
  loss2 = masked_mean(jnp.square(pd) * w, cellmask)

  pgx, pgy = _sobel_ref(flows_p)
  tgx, tgy = _sobel_ref(flows_t)
  L = jnp.square((pgx - tgx) / 5.0) + jnp.square((pgy - tgy) / 5.0)
  loss3 = masked_mean(L * w2, m2) / 10.0

  x, y = boundary_p, boundary_t
  loss4 = 2.0 * jnp.mean(jnp.maximum(x, 0.0) - x * y + jnp.log1p(jnp.exp(-jnp.abs(x))))

  pn = jnp.linalg.norm(flows_p, axis=1) / 5.0
  tn = jnp.linalg.norm(flows_t, axis=1) / 5.0
  loss5 = 2.0 * masked_mean(jnp.square(pn - tn) * w, cellmask)

  loss6 = 2.0 * wmse(dist_p, dist_t, w)

  pgx, pgy = _sobel_ref(dist_p[:, None])
  tgx, tgy = _sobel_ref(dist_t[:, None])
  L = jnp.square((pgx - tgx) / 5.0) + jnp.square((pgy - tgy) / 5.0)
  loss7 = masked_mean(L[:, 0] * w, cellmask) / 10.0

  return loss1 + loss2 + loss3 + loss4 + loss5 + loss6 + loss7


if __name__ == "__main__":
  key = jax.random.PRNGKey(0)
  kp, kt = jax.random.split(key)
  B, H, W = 2, 16, 16
  prediction = jax.random.normal(kp, (B, 4, H, W), dtype=jnp.float32)
  target = jax.random.normal(kt, (B, 8, H, W), dtype=jnp.float32)

  out = omni_loss(prediction, target)
  out = jax.block_until_ready(out)

  ref = omni_loss_ref(prediction, target)
  rel_err = abs(float(out) - float(ref)) / max(abs(float(ref)), 1e-6)
  if not jnp.isfinite(out) or rel_err > 2e-3:
    raise AssertionError(f"mismatch: kernel={float(out)} ref={float(ref)} rel={rel_err}")

  print("KERNEL_OK")
</pallas_src>

<mosaic_0001>
module attributes {stable_mosaic.version = 11 : i64} {
  func.func @_omni_loss_kernel(%arg0: i32, %arg1: memref<1x4x16x16xf32, #tpu.memory_space<vmem>>, %arg2: memref<1x1x16x16xf32, #tpu.memory_space<vmem>>, %arg3: memref<1x1x16x16xf32, #tpu.memory_space<vmem>>, %arg4: memref<1x1x16x16xf32, #tpu.memory_space<vmem>>, %arg5: memref<1x1x16x16xf32, #tpu.memory_space<vmem>>, %arg6: memref<1x1x16x16xf32, #tpu.memory_space<vmem>>, %arg7: memref<1x1x8xf32, #tpu.memory_space<vmem>>) attributes {dimension_semantics = [#tpu.dimension_semantics<parallel>], iteration_bounds = array<i64: 2>, scalar_prefetch = 0 : i64, scratch_operands = 0 : i64, tpu.core_type = #tpu.core_type<tc>, window_params = [{transform_indices = @transform_0, window_bounds = array<i64: 1, 4, 16, 16>}, {transform_indices = @transform_1, window_bounds = array<i64: 1, 1, 16, 16>}, {transform_indices = @transform_2, window_bounds = array<i64: 1, 1, 16, 16>}, {transform_indices = @transform_3, window_bounds = array<i64: 1, 1, 16, 16>}, {transform_indices = @transform_4, window_bounds = array<i64: 1, 1, 16, 16>}, {transform_indices = @transform_5, window_bounds = array<i64: 1, 1, 16, 16>}, {transform_indices = @transform_6, window_bounds = array<i64: 1, 1, 8>}]} {
    %c0 = arith.constant 0 : index
    %c0_0 = arith.constant 0 : index
    %c0_1 = arith.constant 0 : index
    %c0_2 = arith.constant 0 : index
    %0 = vector.load %arg1[%c0, %c0_0, %c0_1, %c0_2] : memref<1x4x16x16xf32, #tpu.memory_space<vmem>>, vector<1x1x16x16xf32>
    %1 = vector.shape_cast %0 : vector<1x1x16x16xf32> to vector<16x16xf32>
    %c0_3 = arith.constant 0 : index
    %c1 = arith.constant 1 : index
    %c0_4 = arith.constant 0 : index
    %c0_5 = arith.constant 0 : index
    %2 = vector.load %arg1[%c0_3, %c1, %c0_4, %c0_5] : memref<1x4x16x16xf32, #tpu.memory_space<vmem>>, vector<1x1x16x16xf32>
    %3 = vector.shape_cast %2 : vector<1x1x16x16xf32> to vector<16x16xf32>
    %c0_6 = arith.constant 0 : index
    %c2 = arith.constant 2 : index
    %c0_7 = arith.constant 0 : index
    %c0_8 = arith.constant 0 : index
    %4 = vector.load %arg1[%c0_6, %c2, %c0_7, %c0_8] : memref<1x4x16x16xf32, #tpu.memory_space<vmem>>, vector<1x1x16x16xf32>
    %5 = vector.shape_cast %4 : vector<1x1x16x16xf32> to vector<16x16xf32>
    %c0_9 = arith.constant 0 : index
    %c3 = arith.constant 3 : index
    %c0_10 = arith.constant 0 : index
    %c0_11 = arith.constant 0 : index
    %6 = vector.load %arg1[%c0_9, %c3, %c0_10, %c0_11] : memref<1x4x16x16xf32, #tpu.memory_space<vmem>>, vector<1x1x16x16xf32>
    %7 = vector.shape_cast %6 : vector<1x1x16x16xf32> to vector<16x16xf32>
    %c0_12 = arith.constant 0 : index
    %c0_13 = arith.constant 0 : index
    %c0_14 = arith.constant 0 : index
    %c0_15 = arith.constant 0 : index
    %8 = vector.load %arg2[%c0_12, %c0_13, %c0_14, %c0_15] : memref<1x1x16x16xf32, #tpu.memory_space<vmem>>, vector<1x1x16x16xf32>
    %9 = vector.shape_cast %8 : vector<1x1x16x16xf32> to vector<16x16xf32>
    %c0_16 = arith.constant 0 : index
    %c0_17 = arith.constant 0 : index
    %c0_18 = arith.constant 0 : index
    %c0_19 = arith.constant 0 : index
    %10 = vector.load %arg3[%c0_16, %c0_17, %c0_18, %c0_19] : memref<1x1x16x16xf32, #tpu.memory_space<vmem>>, vector<1x1x16x16xf32>
    %11 = vector.shape_cast %10 : vector<1x1x16x16xf32> to vector<16x16xf32>
    %c0_20 = arith.constant 0 : index
    %c0_21 = arith.constant 0 : index
    %c0_22 = arith.constant 0 : index
    %c0_23 = arith.constant 0 : index
    %12 = vector.load %arg4[%c0_20, %c0_21, %c0_22, %c0_23] : memref<1x1x16x16xf32, #tpu.memory_space<vmem>>, vector<1x1x16x16xf32>
    %13 = vector.shape_cast %12 : vector<1x1x16x16xf32> to vector<16x16xf32>
    %c0_24 = arith.constant 0 : index
    %c0_25 = arith.constant 0 : index
    %c0_26 = arith.constant 0 : index
    %c0_27 = arith.constant 0 : index
    %14 = vector.load %arg5[%c0_24, %c0_25, %c0_26, %c0_27] : memref<1x1x16x16xf32, #tpu.memory_space<vmem>>, vector<1x1x16x16xf32>
    %15 = vector.shape_cast %14 : vector<1x1x16x16xf32> to vector<16x16xf32>
    %c0_28 = arith.constant 0 : index
    %c0_29 = arith.constant 0 : index
    %c0_30 = arith.constant 0 : index
    %c0_31 = arith.constant 0 : index
    %16 = vector.load %arg6[%c0_28, %c0_29, %c0_30, %c0_31] : memref<1x1x16x16xf32, #tpu.memory_space<vmem>>, vector<1x1x16x16xf32>
    %17 = vector.shape_cast %16 : vector<1x1x16x16xf32> to vector<16x16xf32>
    %cst = arith.constant 0.000000e+00 : f32
    %18 = vector.broadcast %cst : f32 to vector<16x16xf32>
    %19 = arith.cmpf ogt, %9, %18 : vector<16x16xf32>
    %20 = arith.extui %19 : vector<16x16xi1> to vector<16x16xi32>
    %21 = arith.sitofp %20 : vector<16x16xi32> to vector<16x16xf32>
    %22 = arith.mulf %21, %17 : vector<16x16xf32>
    %23 = tpu.iota {dimensions = array<i32: 0>} : vector<16x16xi32>
    %24 = tpu.iota {dimensions = array<i32: 1>} : vector<16x16xi32>
    %c1_i32 = arith.constant 1 : i32
    %25 = vector.broadcast %c1_i32 : i32 to vector<16x16xi32>
    %26 = arith.cmpi sge, %23, %25 : vector<16x16xi32>
    %27 = arith.extui %26 : vector<16x16xi1> to vector<16x16xi32>
    %28 = arith.sitofp %27 : vector<16x16xi32> to vector<16x16xf32>
    %c14_i32 = arith.constant 14 : i32
    %29 = vector.broadcast %c14_i32 : i32 to vector<16x16xi32>
    %30 = arith.cmpi sle, %23, %29 : vector<16x16xi32>
    %31 = arith.extui %30 : vector<16x16xi1> to vector<16x16xi32>
    %32 = arith.sitofp %31 : vector<16x16xi32> to vector<16x16xf32>
    %c1_i32_32 = arith.constant 1 : i32
    %33 = vector.broadcast %c1_i32_32 : i32 to vector<16x16xi32>
    %34 = arith.cmpi sge, %24, %33 : vector<16x16xi32>
    %35 = arith.extui %34 : vector<16x16xi1> to vector<16x16xi32>
    %36 = arith.sitofp %35 : vector<16x16xi32> to vector<16x16xf32>
    %c14_i32_33 = arith.constant 14 : i32
    %37 = vector.broadcast %c14_i32_33 : i32 to vector<16x16xi32>
    %38 = arith.cmpi sle, %24, %37 : vector<16x16xi32>
    %39 = arith.extui %38 : vector<16x16xi1> to vector<16x16xi32>
    %40 = arith.sitofp %39 : vector<16x16xi32> to vector<16x16xf32>
    %41 = arith.subf %1, %11 : vector<16x16xf32>
    %42 = arith.subf %3, %13 : vector<16x16xf32>
    %43 = arith.subf %5, %9 : vector<16x16xf32>
    %44 = arith.mulf %41, %41 : vector<16x16xf32>
    %45 = arith.mulf %42, %42 : vector<16x16xf32>
    %46 = arith.addf %44, %45 : vector<16x16xf32>
    %47 = arith.mulf %17, %46 : vector<16x16xf32>
    %48 = arith.mulf %1, %1 : vector<16x16xf32>
    %49 = arith.mulf %3, %3 : vector<16x16xf32>
    %50 = arith.addf %48, %49 : vector<16x16xf32>
    %51 = math.sqrt %50 : vector<16x16xf32>
    %52 = arith.mulf %11, %11 : vector<16x16xf32>
    %53 = arith.mulf %13, %13 : vector<16x16xf32>
    %54 = arith.addf %52, %53 : vector<16x16xf32>
    %55 = math.sqrt %54 : vector<16x16xf32>
    %56 = arith.mulf %51, %55 : vector<16x16xf32>
    %cst_34 = arith.constant 9.99999996E-13 : f32
    %57 = vector.broadcast %cst_34 : f32 to vector<16x16xf32>
    %58 = arith.addf %56, %57 : vector<16x16xf32>
    %59 = arith.mulf %1, %11 : vector<16x16xf32>
    %60 = arith.mulf %3, %13 : vector<16x16xf32>
    %61 = arith.addf %59, %60 : vector<16x16xf32>
    %62 = tpu.reciprocal %58 {approx = true} : vector<16x16xf32> -> vector<16x16xf32>
    %63 = arith.mulf %61, %62 : vector<16x16xf32>
    %cst_35 = arith.constant -0.999998986 : f32
    %cst_36 = arith.constant 0.999998986 : f32
    %64 = vector.broadcast %cst_35 : f32 to vector<16x16xf32>
    %65 = arith.maximumf %64, %63 : vector<16x16xf32>
    %66 = vector.broadcast %cst_36 : f32 to vector<16x16xf32>
    %67 = arith.minimumf %66, %65 : vector<16x16xf32>
    %68 = math.absf %67 : vector<16x16xf32>
    %cst_37 = arith.constant 5.000000e-01 : f32
    %69 = vector.broadcast %cst_37 : f32 to vector<16x16xf32>
    %70 = arith.cmpf ogt, %68, %69 : vector<16x16xf32>
    %cst_38 = arith.constant 1.000000e+00 : f32
    %71 = vector.broadcast %cst_38 : f32 to vector<16x16xf32>
    %72 = arith.subf %71, %68 : vector<16x16xf32>
    %cst_39 = arith.constant 5.000000e-01 : f32
    %73 = vector.broadcast %cst_39 : f32 to vector<16x16xf32>
    %74 = arith.mulf %73, %72 : vector<16x16xf32>
    %cst_40 = arith.constant 0.000000e+00 : f32
    %75 = vector.broadcast %cst_40 : f32 to vector<16x16xf32>
    %76 = arith.maximumf %74, %75 : vector<16x16xf32>
    %77 = math.sqrt %76 : vector<16x16xf32>
    %78 = arith.mulf %77, %77 : vector<16x16xf32>
    %cst_41 = arith.constant 4.216320e-02 : f32
    %79 = vector.broadcast %cst_41 : f32 to vector<16x16xf32>
    %80 = arith.mulf %79, %78 : vector<16x16xf32>
    %cst_42 = arith.constant 0.024181312 : f32
    %81 = vector.broadcast %cst_42 : f32 to vector<16x16xf32>
    %82 = arith.addf %80, %81 : vector<16x16xf32>
    %83 = arith.mulf %82, %78 : vector<16x16xf32>
    %cst_43 = arith.constant 0.0454700254 : f32
    %84 = vector.broadcast %cst_43 : f32 to vector<16x16xf32>
    %85 = arith.addf %83, %84 : vector<16x16xf32>
    %86 = arith.mulf %85, %78 : vector<16x16xf32>
    %cst_44 = arith.constant 0.0749530047 : f32
    %87 = vector.broadcast %cst_44 : f32 to vector<16x16xf32>
    %88 = arith.addf %86, %87 : vector<16x16xf32>
    %89 = arith.mulf %88, %78 : vector<16x16xf32>
    %cst_45 = arith.constant 0.166667521 : f32
    %90 = vector.broadcast %cst_45 : f32 to vector<16x16xf32>
    %91 = arith.addf %89, %90 : vector<16x16xf32>
    %92 = arith.mulf %77, %78 : vector<16x16xf32>
    %93 = arith.mulf %92, %91 : vector<16x16xf32>
    %94 = arith.addf %77, %93 : vector<16x16xf32>
    %cst_46 = arith.constant 2.000000e+00 : f32
    %95 = vector.broadcast %cst_46 : f32 to vector<16x16xf32>
    %96 = arith.mulf %95, %94 : vector<16x16xf32>
    %cst_47 = arith.constant 0.000000e+00 : f32
    %97 = vector.broadcast %cst_47 : f32 to vector<16x16xf32>
    %98 = arith.cmpf ogt, %67, %97 : vector<16x16xf32>
    %cst_48 = arith.constant 3.14159274 : f32
    %99 = vector.broadcast %cst_48 : f32 to vector<16x16xf32>
    %100 = arith.subf %99, %96 : vector<16x16xf32>
    %101 = arith.select %98, %96, %100 : vector<16x16xi1>, vector<16x16xf32>
    %102 = arith.mulf %67, %67 : vector<16x16xf32>
    %cst_49 = arith.constant 4.216320e-02 : f32
    %103 = vector.broadcast %cst_49 : f32 to vector<16x16xf32>
    %104 = arith.mulf %103, %102 : vector<16x16xf32>
    %cst_50 = arith.constant 0.024181312 : f32
    %105 = vector.broadcast %cst_50 : f32 to vector<16x16xf32>
    %106 = arith.addf %104, %105 : vector<16x16xf32>
    %107 = arith.mulf %106, %102 : vector<16x16xf32>
    %cst_51 = arith.constant 0.0454700254 : f32
    %108 = vector.broadcast %cst_51 : f32 to vector<16x16xf32>
    %109 = arith.addf %107, %108 : vector<16x16xf32>
    %110 = arith.mulf %109, %102 : vector<16x16xf32>
    %cst_52 = arith.constant 0.0749530047 : f32
    %111 = vector.broadcast %cst_52 : f32 to vector<16x16xf32>
    %112 = arith.addf %110, %111 : vector<16x16xf32>
    %113 = arith.mulf %112, %102 : vector<16x16xf32>
    %cst_53 = arith.constant 0.166667521 : f32
    %114 = vector.broadcast %cst_53 : f32 to vector<16x16xf32>
    %115 = arith.addf %113, %114 : vector<16x16xf32>
    %116 = arith.mulf %67, %102 : vector<16x16xf32>
    %117 = arith.mulf %116, %115 : vector<16x16xf32>
    %118 = arith.addf %67, %117 : vector<16x16xf32>
    %cst_54 = arith.constant 1.57079637 : f32
    %119 = vector.broadcast %cst_54 : f32 to vector<16x16xf32>
    %120 = arith.subf %119, %118 : vector<16x16xf32>
    %121 = arith.select %70, %101, %120 : vector<16x16xi1>, vector<16x16xf32>
    %122 = arith.mulf %121, %121 : vector<16x16xf32>
    %123 = arith.mulf %22, %122 : vector<16x16xf32>
    %c1_i32_55 = arith.constant 1 : i32
    %124 = tpu.dynamic_rotate %41 by %c1_i32_55 dim 0 : vector<16x16xf32>, i32 -> vector<16x16xf32>
    %125 = arith.mulf %124, %28 : vector<16x16xf32>
    %c15_i32 = arith.constant 15 : i32
    %126 = tpu.dynamic_rotate %41 by %c15_i32 dim 0 : vector<16x16xf32>, i32 -> vector<16x16xf32>
    %127 = arith.mulf %126, %32 : vector<16x16xf32>
    %cst_56 = arith.constant 2.000000e+00 : f32
    %128 = vector.broadcast %cst_56 : f32 to vector<16x16xf32>
    %129 = arith.mulf %128, %41 : vector<16x16xf32>
    %130 = arith.addf %125, %129 : vector<16x16xf32>
    %131 = arith.addf %130, %127 : vector<16x16xf32>
    %132 = arith.subf %127, %125 : vector<16x16xf32>
    %c15_i32_57 = arith.constant 15 : i32
    %133 = tpu.dynamic_rotate %131 by %c15_i32_57 dim 1 : vector<16x16xf32>, i32 -> vector<16x16xf32>
    %134 = arith.mulf %133, %40 : vector<16x16xf32>
    %c1_i32_58 = arith.constant 1 : i32
    %135 = tpu.dynamic_rotate %131 by %c1_i32_58 dim 1 : vector<16x16xf32>, i32 -> vector<16x16xf32>
    %136 = arith.mulf %135, %36 : vector<16x16xf32>
    %137 = arith.subf %134, %136 : vector<16x16xf32>
    %c1_i32_59 = arith.constant 1 : i32
    %138 = tpu.dynamic_rotate %132 by %c1_i32_59 dim 1 : vector<16x16xf32>, i32 -> vector<16x16xf32>
    %139 = arith.mulf %138, %36 : vector<16x16xf32>
    %cst_60 = arith.constant 2.000000e+00 : f32
    %140 = vector.broadcast %cst_60 : f32 to vector<16x16xf32>
    %141 = arith.mulf %140, %132 : vector<16x16xf32>
    %142 = arith.addf %139, %141 : vector<16x16xf32>
    %c15_i32_61 = arith.constant 15 : i32
    %143 = tpu.dynamic_rotate %132 by %c15_i32_61 dim 1 : vector<16x16xf32>, i32 -> vector<16x16xf32>
    %144 = arith.mulf %143, %40 : vector<16x16xf32>
    %145 = arith.addf %142, %144 : vector<16x16xf32>
    %c1_i32_62 = arith.constant 1 : i32
    %146 = tpu.dynamic_rotate %42 by %c1_i32_62 dim 0 : vector<16x16xf32>, i32 -> vector<16x16xf32>
    %147 = arith.mulf %146, %28 : vector<16x16xf32>
    %c15_i32_63 = arith.constant 15 : i32
    %148 = tpu.dynamic_rotate %42 by %c15_i32_63 dim 0 : vector<16x16xf32>, i32 -> vector<16x16xf32>
    %149 = arith.mulf %148, %32 : vector<16x16xf32>
    %cst_64 = arith.constant 2.000000e+00 : f32
    %150 = vector.broadcast %cst_64 : f32 to vector<16x16xf32>
    %151 = arith.mulf %150, %42 : vector<16x16xf32>
    %152 = arith.addf %147, %151 : vector<16x16xf32>
    %153 = arith.addf %152, %149 : vector<16x16xf32>
    %154 = arith.subf %149, %147 : vector<16x16xf32>
    %c15_i32_65 = arith.constant 15 : i32
    %155 = tpu.dynamic_rotate %153 by %c15_i32_65 dim 1 : vector<16x16xf32>, i32 -> vector<16x16xf32>
    %156 = arith.mulf %155, %40 : vector<16x16xf32>
    %c1_i32_66 = arith.constant 1 : i32
    %157 = tpu.dynamic_rotate %153 by %c1_i32_66 dim 1 : vector<16x16xf32>, i32 -> vector<16x16xf32>
    %158 = arith.mulf %157, %36 : vector<16x16xf32>
    %159 = arith.subf %156, %158 : vector<16x16xf32>
    %c1_i32_67 = arith.constant 1 : i32
    %160 = tpu.dynamic_rotate %154 by %c1_i32_67 dim 1 : vector<16x16xf32>, i32 -> vector<16x16xf32>
    %161 = arith.mulf %160, %36 : vector<16x16xf32>
    %cst_68 = arith.constant 2.000000e+00 : f32
    %162 = vector.broadcast %cst_68 : f32 to vector<16x16xf32>
    %163 = arith.mulf %162, %154 : vector<16x16xf32>
    %164 = arith.addf %161, %163 : vector<16x16xf32>
    %c15_i32_69 = arith.constant 15 : i32
    %165 = tpu.dynamic_rotate %154 by %c15_i32_69 dim 1 : vector<16x16xf32>, i32 -> vector<16x16xf32>
    %166 = arith.mulf %165, %40 : vector<16x16xf32>
    %167 = arith.addf %164, %166 : vector<16x16xf32>
    %168 = arith.mulf %137, %137 : vector<16x16xf32>
    %169 = arith.mulf %145, %145 : vector<16x16xf32>
    %170 = arith.addf %168, %169 : vector<16x16xf32>
    %171 = arith.mulf %159, %159 : vector<16x16xf32>
    %172 = arith.addf %170, %171 : vector<16x16xf32>
    %173 = arith.mulf %167, %167 : vector<16x16xf32>
    %174 = arith.addf %172, %173 : vector<16x16xf32>
    %175 = arith.mulf %22, %174 : vector<16x16xf32>
    %cst_70 = arith.constant 0.000000e+00 : f32
    %176 = vector.broadcast %cst_70 : f32 to vector<16x16xf32>
    %177 = arith.maximumf %7, %176 : vector<16x16xf32>
    %178 = arith.mulf %7, %15 : vector<16x16xf32>
    %179 = arith.subf %177, %178 : vector<16x16xf32>
    %180 = math.absf %7 : vector<16x16xf32>
    %cst_71 = arith.constant 0.000000e+00 : f32
    %181 = vector.broadcast %cst_71 : f32 to vector<16x16xf32>
    %182 = arith.subf %181, %180 : vector<16x16xf32>
    %183 = math.exp %182 : vector<16x16xf32>
    %184 = math.log1p %183 : vector<16x16xf32>
    %185 = arith.addf %179, %184 : vector<16x16xf32>
    %186 = arith.subf %51, %55 : vector<16x16xf32>
    %187 = arith.mulf %186, %186 : vector<16x16xf32>
    %188 = arith.mulf %22, %187 : vector<16x16xf32>
    %189 = arith.mulf %43, %43 : vector<16x16xf32>
    %190 = arith.mulf %17, %189 : vector<16x16xf32>
    %c1_i32_72 = arith.constant 1 : i32
    %191 = tpu.dynamic_rotate %43 by %c1_i32_72 dim 0 : vector<16x16xf32>, i32 -> vector<16x16xf32>
    %192 = arith.mulf %191, %28 : vector<16x16xf32>
    %c15_i32_73 = arith.constant 15 : i32
    %193 = tpu.dynamic_rotate %43 by %c15_i32_73 dim 0 : vector<16x16xf32>, i32 -> vector<16x16xf32>
    %194 = arith.mulf %193, %32 : vector<16x16xf32>
    %cst_74 = arith.constant 2.000000e+00 : f32
    %195 = vector.broadcast %cst_74 : f32 to vector<16x16xf32>
    %196 = arith.mulf %195, %43 : vector<16x16xf32>
    %197 = arith.addf %192, %196 : vector<16x16xf32>
    %198 = arith.addf %197, %194 : vector<16x16xf32>
    %199 = arith.subf %194, %192 : vector<16x16xf32>
    %c15_i32_75 = arith.constant 15 : i32
    %200 = tpu.dynamic_rotate %198 by %c15_i32_75 dim 1 : vector<16x16xf32>, i32 -> vector<16x16xf32>
    %201 = arith.mulf %200, %40 : vector<16x16xf32>
    %c1_i32_76 = arith.constant 1 : i32
    %202 = tpu.dynamic_rotate %198 by %c1_i32_76 dim 1 : vector<16x16xf32>, i32 -> vector<16x16xf32>
    %203 = arith.mulf %202, %36 : vector<16x16xf32>
    %204 = arith.subf %201, %203 : vector<16x16xf32>
    %c1_i32_77 = arith.constant 1 : i32
    %205 = tpu.dynamic_rotate %199 by %c1_i32_77 dim 1 : vector<16x16xf32>, i32 -> vector<16x16xf32>
    %206 = arith.mulf %205, %36 : vector<16x16xf32>
    %cst_78 = arith.constant 2.000000e+00 : f32
    %207 = vector.broadcast %cst_78 : f32 to vector<16x16xf32>
    %208 = arith.mulf %207, %199 : vector<16x16xf32>
    %209 = arith.addf %206, %208 : vector<16x16xf32>
    %c15_i32_79 = arith.constant 15 : i32
    %210 = tpu.dynamic_rotate %199 by %c15_i32_79 dim 1 : vector<16x16xf32>, i32 -> vector<16x16xf32>
    %211 = arith.mulf %210, %40 : vector<16x16xf32>
    %212 = arith.addf %209, %211 : vector<16x16xf32>
    %213 = arith.mulf %204, %204 : vector<16x16xf32>
    %214 = arith.mulf %212, %212 : vector<16x16xf32>
    %215 = arith.addf %213, %214 : vector<16x16xf32>
    %216 = arith.mulf %22, %215 : vector<16x16xf32>
    %217 = tpu.iota {dimensions = array<i32: 1>} : vector<1x8xi32>
    %cst_80 = arith.constant 0.000000e+00 : f32
    %218 = vector.broadcast %cst_80 : f32 to vector<1x8xf32>
    %c0_i32 = arith.constant 0 : i32
    %219 = vector.broadcast %c0_i32 : i32 to vector<1x8xi32>
    %220 = arith.cmpi eq, %217, %219 : vector<1x8xi32>
    %221 = arith.extui %220 : vector<1x8xi1> to vector<1x8xi32>
    %222 = arith.sitofp %221 : vector<1x8xi32> to vector<1x8xf32>
    %223 = vector.shape_cast %47 : vector<16x16xf32> to vector<1x16x16xf32>
    %cst_81 = arith.constant dense<0.000000e+00> : vector<1xf32>
    %224 = vector.multi_reduction <add>, %223, %cst_81 [1, 2] : vector<1x16x16xf32> to vector<1xf32>
    %225 = vector.shape_cast %224 : vector<1xf32> to vector<1x1x1xf32>
    %226 = vector.extract %225[0, 0, 0] : f32 from vector<1x1x1xf32>
    %227 = vector.broadcast %226 : f32 to vector<1x1xf32>
    %228 = vector.broadcast %227 : vector<1x1xf32> to vector<1x8xf32>
    %229 = arith.mulf %222, %228 : vector<1x8xf32>
    %230 = arith.addf %218, %229 : vector<1x8xf32>
    %c1_i32_82 = arith.constant 1 : i32
    %231 = vector.broadcast %c1_i32_82 : i32 to vector<1x8xi32>
    %232 = arith.cmpi eq, %217, %231 : vector<1x8xi32>
    %233 = arith.extui %232 : vector<1x8xi1> to vector<1x8xi32>
    %234 = arith.sitofp %233 : vector<1x8xi32> to vector<1x8xf32>
    %235 = vector.shape_cast %123 : vector<16x16xf32> to vector<1x16x16xf32>
    %cst_83 = arith.constant dense<0.000000e+00> : vector<1xf32>
    %236 = vector.multi_reduction <add>, %235, %cst_83 [1, 2] : vector<1x16x16xf32> to vector<1xf32>
    %237 = vector.shape_cast %236 : vector<1xf32> to vector<1x1x1xf32>
    %238 = vector.extract %237[0, 0, 0] : f32 from vector<1x1x1xf32>
    %239 = vector.broadcast %238 : f32 to vector<1x1xf32>
    %240 = vector.broadcast %239 : vector<1x1xf32> to vector<1x8xf32>
    %241 = arith.mulf %234, %240 : vector<1x8xf32>
    %242 = arith.addf %230, %241 : vector<1x8xf32>
    %c2_i32 = arith.constant 2 : i32
    %243 = vector.broadcast %c2_i32 : i32 to vector<1x8xi32>
    %244 = arith.cmpi eq, %217, %243 : vector<1x8xi32>
    %245 = arith.extui %244 : vector<1x8xi1> to vector<1x8xi32>
    %246 = arith.sitofp %245 : vector<1x8xi32> to vector<1x8xf32>
    %247 = vector.shape_cast %175 : vector<16x16xf32> to vector<1x16x16xf32>
    %cst_84 = arith.constant dense<0.000000e+00> : vector<1xf32>
    %248 = vector.multi_reduction <add>, %247, %cst_84 [1, 2] : vector<1x16x16xf32> to vector<1xf32>
    %249 = vector.shape_cast %248 : vector<1xf32> to vector<1x1x1xf32>
    %250 = vector.extract %249[0, 0, 0] : f32 from vector<1x1x1xf32>
    %251 = vector.broadcast %250 : f32 to vector<1x1xf32>
    %252 = vector.broadcast %251 : vector<1x1xf32> to vector<1x8xf32>
    %253 = arith.mulf %246, %252 : vector<1x8xf32>
    %254 = arith.addf %242, %253 : vector<1x8xf32>
    %c3_i32 = arith.constant 3 : i32
    %255 = vector.broadcast %c3_i32 : i32 to vector<1x8xi32>
    %256 = arith.cmpi eq, %217, %255 : vector<1x8xi32>
    %257 = arith.extui %256 : vector<1x8xi1> to vector<1x8xi32>
    %258 = arith.sitofp %257 : vector<1x8xi32> to vector<1x8xf32>
    %259 = vector.shape_cast %185 : vector<16x16xf32> to vector<1x16x16xf32>
    %cst_85 = arith.constant dense<0.000000e+00> : vector<1xf32>
    %260 = vector.multi_reduction <add>, %259, %cst_85 [1, 2] : vector<1x16x16xf32> to vector<1xf32>
    %261 = vector.shape_cast %260 : vector<1xf32> to vector<1x1x1xf32>
    %262 = vector.extract %261[0, 0, 0] : f32 from vector<1x1x1xf32>
    %263 = vector.broadcast %262 : f32 to vector<1x1xf32>
    %264 = vector.broadcast %263 : vector<1x1xf32> to vector<1x8xf32>
    %265 = arith.mulf %258, %264 : vector<1x8xf32>
    %266 = arith.addf %254, %265 : vector<1x8xf32>
    %c4_i32 = arith.constant 4 : i32
    %267 = vector.broadcast %c4_i32 : i32 to vector<1x8xi32>
    %268 = arith.cmpi eq, %217, %267 : vector<1x8xi32>
    %269 = arith.extui %268 : vector<1x8xi1> to vector<1x8xi32>
    %270 = arith.sitofp %269 : vector<1x8xi32> to vector<1x8xf32>
    %271 = vector.shape_cast %188 : vector<16x16xf32> to vector<1x16x16xf32>
    %cst_86 = arith.constant dense<0.000000e+00> : vector<1xf32>
    %272 = vector.multi_reduction <add>, %271, %cst_86 [1, 2] : vector<1x16x16xf32> to vector<1xf32>
    %273 = vector.shape_cast %272 : vector<1xf32> to vector<1x1x1xf32>
    %274 = vector.extract %273[0, 0, 0] : f32 from vector<1x1x1xf32>
    %275 = vector.broadcast %274 : f32 to vector<1x1xf32>
    %276 = vector.broadcast %275 : vector<1x1xf32> to vector<1x8xf32>
    %277 = arith.mulf %270, %276 : vector<1x8xf32>
    %278 = arith.addf %266, %277 : vector<1x8xf32>
    %c5_i32 = arith.constant 5 : i32
    %279 = vector.broadcast %c5_i32 : i32 to vector<1x8xi32>
    %280 = arith.cmpi eq, %217, %279 : vector<1x8xi32>
    %281 = arith.extui %280 : vector<1x8xi1> to vector<1x8xi32>
    %282 = arith.sitofp %281 : vector<1x8xi32> to vector<1x8xf32>
    %283 = vector.shape_cast %190 : vector<16x16xf32> to vector<1x16x16xf32>
    %cst_87 = arith.constant dense<0.000000e+00> : vector<1xf32>
    %284 = vector.multi_reduction <add>, %283, %cst_87 [1, 2] : vector<1x16x16xf32> to vector<1xf32>
    %285 = vector.shape_cast %284 : vector<1xf32> to vector<1x1x1xf32>
    %286 = vector.extract %285[0, 0, 0] : f32 from vector<1x1x1xf32>
    %287 = vector.broadcast %286 : f32 to vector<1x1xf32>
    %288 = vector.broadcast %287 : vector<1x1xf32> to vector<1x8xf32>
    %289 = arith.mulf %282, %288 : vector<1x8xf32>
    %290 = arith.addf %278, %289 : vector<1x8xf32>
    %c6_i32 = arith.constant 6 : i32
    %291 = vector.broadcast %c6_i32 : i32 to vector<1x8xi32>
    %292 = arith.cmpi eq, %217, %291 : vector<1x8xi32>
    %293 = arith.extui %292 : vector<1x8xi1> to vector<1x8xi32>
    %294 = arith.sitofp %293 : vector<1x8xi32> to vector<1x8xf32>
    %295 = vector.shape_cast %216 : vector<16x16xf32> to vector<1x16x16xf32>
    %cst_88 = arith.constant dense<0.000000e+00> : vector<1xf32>
    %296 = vector.multi_reduction <add>, %295, %cst_88 [1, 2] : vector<1x16x16xf32> to vector<1xf32>
    %297 = vector.shape_cast %296 : vector<1xf32> to vector<1x1x1xf32>
    %298 = vector.extract %297[0, 0, 0] : f32 from vector<1x1x1xf32>
    %299 = vector.broadcast %298 : f32 to vector<1x1xf32>
    %300 = vector.broadcast %299 : vector<1x1xf32> to vector<1x8xf32>
    %301 = arith.mulf %294, %300 : vector<1x8xf32>
    %302 = arith.addf %290, %301 : vector<1x8xf32>
    %c7_i32 = arith.constant 7 : i32
    %303 = vector.broadcast %c7_i32 : i32 to vector<1x8xi32>
    %304 = arith.cmpi eq, %217, %303 : vector<1x8xi32>
    %305 = arith.extui %304 : vector<1x8xi1> to vector<1x8xi32>
    %306 = arith.sitofp %305 : vector<1x8xi32> to vector<1x8xf32>
    %307 = vector.shape_cast %21 : vector<16x16xf32> to vector<1x16x16xf32>
    %cst_89 = arith.constant dense<0.000000e+00> : vector<1xf32>
    %308 = vector.multi_reduction <add>, %307, %cst_89 [1, 2] : vector<1x16x16xf32> to vector<1xf32>
    %309 = vector.shape_cast %308 : vector<1xf32> to vector<1x1x1xf32>
    %310 = vector.extract %309[0, 0, 0] : f32 from vector<1x1x1xf32>
    %311 = vector.broadcast %310 : f32 to vector<1x1xf32>
    %312 = vector.broadcast %311 : vector<1x1xf32> to vector<1x8xf32>
    %313 = arith.mulf %306, %312 : vector<1x8xf32>
    %314 = arith.addf %302, %313 : vector<1x8xf32>
    %c0_90 = arith.constant 0 : index
    %c0_91 = arith.constant 0 : index
    %c0_92 = arith.constant 0 : index
    %315 = vector.load %arg7[%c0_90, %c0_91, %c0_92] : memref<1x1x8xf32, #tpu.memory_space<vmem>>, vector<1x1x8xf32>
    %316 = vector.shape_cast %315 : vector<1x1x8xf32> to vector<1x8xf32>
    %317 = vector.shape_cast %314 : vector<1x8xf32> to vector<1x1x8xf32>
    tpu.vector_store %arg7[%c0_90, %c0_91, %c0_92], %317 {strides = array<i32>} : memref<1x1x8xf32, #tpu.memory_space<vmem>>, vector<1x1x8xf32>,
    return
  }
  func.func @transform_0(%arg0: i32) -> (i32, i32, i32, i32) {
    %c0_i32 = arith.constant 0 : i32
    %c0_i32_0 = arith.constant 0 : i32
    %c0_i32_1 = arith.constant 0 : i32
    %c0_i32_2 = arith.constant 0 : i32
    return %arg0, %c0_i32, %c0_i32_0, %c0_i32_1 : i32, i32, i32, i32
  }
  func.func @transform_1(%arg0: i32) -> (i32, i32, i32, i32) {
    %c1_i32 = arith.constant 1 : i32
    %c0_i32 = arith.constant 0 : i32
    %c0_i32_0 = arith.constant 0 : i32
    %c0_i32_1 = arith.constant 0 : i32
    return %arg0, %c1_i32, %c0_i32, %c0_i32_0 : i32, i32, i32, i32
  }
  func.func @transform_2(%arg0: i32) -> (i32, i32, i32, i32) {
    %c2_i32 = arith.constant 2 : i32
    %c0_i32 = arith.constant 0 : i32
    %c0_i32_0 = arith.constant 0 : i32
    %c0_i32_1 = arith.constant 0 : i32
    return %arg0, %c2_i32, %c0_i32, %c0_i32_0 : i32, i32, i32, i32
  }
  func.func @transform_3(%arg0: i32) -> (i32, i32, i32, i32) {
    %c3_i32 = arith.constant 3 : i32
    %c0_i32 = arith.constant 0 : i32
    %c0_i32_0 = arith.constant 0 : i32
    %c0_i32_1 = arith.constant 0 : i32
    return %arg0, %c3_i32, %c0_i32, %c0_i32_0 : i32, i32, i32, i32
  }
  func.func @transform_4(%arg0: i32) -> (i32, i32, i32, i32) {
    %c5_i32 = arith.constant 5 : i32
    %c0_i32 = arith.constant 0 : i32
    %c0_i32_0 = arith.constant 0 : i32
    %c0_i32_1 = arith.constant 0 : i32
    return %arg0, %c5_i32, %c0_i32, %c0_i32_0 : i32, i32, i32, i32
  }
  func.func @transform_5(%arg0: i32) -> (i32, i32, i32, i32) {
    %c7_i32 = arith.constant 7 : i32
    %c0_i32 = arith.constant 0 : i32
    %c0_i32_0 = arith.constant 0 : i32
    %c0_i32_1 = arith.constant 0 : i32
    return %arg0, %c7_i32, %c0_i32, %c0_i32_0 : i32, i32, i32, i32
  }
  func.func @transform_6(%arg0: i32) -> (i32, i32, i32) {
    %c0_i32 = arith.constant 0 : i32
    %c0_i32_0 = arith.constant 0 : i32
    %c0_i32_1 = arith.constant 0 : i32
    return %arg0, %c0_i32, %c0_i32_0 : i32, i32, i32
  }
}

</mosaic_0001>

<bundles_post_ra>
// kernel: tpu_custom_call.1
= control target key start
LH: loop header
LB: loop body
LE: loop exit
PB: predicated region body
PF: predicated region fallthrough
CT: control target
= control target key end

     0   :  { %s2740_s0 = inlined_call_operand.hbm [shape: f32[2,4,16,16], index: 0, kind: input, shape index: {}]   ;;  %s2741_s1 = inlined_call_operand.hbm [shape: f32[2,8,16,16], index: 1, kind: input, shape index: {}]   ;;  %s2742_s2 = inlined_call_operand.hbm [shape: f32[2,8,16,16], index: 2, kind: input, shape index: {}]   ;;  %s2743_s3 = inlined_call_operand.hbm [shape: f32[2,8,16,16], index: 3, kind: input, shape index: {}]   ;;  %s2744_s4 = inlined_call_operand.hbm [shape: f32[2,8,16,16], index: 4, kind: input, shape index: {}]   ;;  %s2745_s5 = inlined_call_operand.hbm [shape: f32[2,8,16,16], index: 5, kind: input, shape index: {}]   ;;  %s2746_s6 = inlined_call_operand.hbm [shape: f32[2,1,8], index: 6, kind: output, shape index: {}]  }
   0x1   :  { %2761 = sst [smem:[#allocation25_spill]] %s2741_s1 }
   0x2   :  { %2762 = sst [smem:[#allocation26_spill]] %s2743_s3 }
   0x3   :  { %2763 = sst [smem:[#allocation27_spill]] %s2746_s6 }
   0x4   :  { %11 = vsyncpa [#allocation3], 0 }
   0x5   :  { %13 = vsyncpa [#allocation3 + $0x1], 0 }
   0x6   :  { %14 = vsyncpa [#allocation6], 0 }
   0x7   :  { %16 = vsyncpa [#allocation6 + $0x1], 0 }
   0x8   :  { %17 = vsyncpa [#allocation9], 0 }
   0x9   :  { %19 = vsyncpa [#allocation9 + $0x1], 0 }
   0xa   :  { %20 = vsyncpa [#allocation12], 0 }
   0xb   :  { %22 = vsyncpa [#allocation12 + $0x1], 0 }
   0xc   :  { %23 = vsyncpa [#allocation4], 0 }
   0xd   :  { %25 = vsyncpa [#allocation4 + $0x1], 0  ;;  %s1891_s21 = smov 0   ;;  %s1893_s22 = smov 0  }
   0xe   :  { %s1895_s23 = smov 0   ;;  %s1897_s24 = smov 0  }
   0xf LB: > { %2764 = sst [smem:[#allocation19_spill]] %s1826_s21  ;;  %s1912_s25 = sadd.s32 4294967295, %s1838_s24   ;;  %s1838_s24 = sphi %s1897_s24, %s2790_s24   ;;  %s1834_s23 = sphi %s1895_s23, %s2792_s23   ;;  %s1830_s22 = sphi %s1893_s22, %s2794_s22   ;;  %s1826_s21 = sphi %s1891_s21, %s2793_s21  }
  0x10   : > { %2765 = sst [smem:[#allocation20_spill]] %s1834_s23  ;;  %s1396_s26 = sadd.s32 4294967294, %s1838_s24  }
  0x11   : > { %2766 = sst [smem:[#allocation21_spill]] %s1838_s24  ;;  %s1916_s27 = sadd.s32 1, %s1838_s24  }
  0x12   : > { %2767 = sst [smem:[#allocation22_spill]] %s1916_s27  ;;  %s38_s28 = sadd.s32 1, %s1834_s23 }
  0x13   : > { %s35_s29 = ssub.s32 %s1838_s24, %s1916_s27  ;;  %p45_p0 = scmp.ne.s32.totalorder %s1834_s23, %s1830_s22 }
  0x14   : > { %p36_p1 = scmp.eq.s32.totalorder %s35_s29, 0  ;;  %p46_p2 = scmp.eq.s32.totalorder %s1838_s24, 0 }
  0x15   : > { %p51_p3 = scmp.ne.s32.totalorder %s1830_s22, %s1826_s21  ;;  %p52_p4 = scmp.eq.s32.totalorder %s1912_s25, 0 }
  0x16   : > { %s1928_s30 = scalar_select %p36_p1, %s1834_s23, %s38_s28  }
  0x17   : > { %p47_p5 = por %p46_p2, %p45_p0  ;;  %p1930_p6 = por %p52_p4, %p51_p3 }
  0x18   : > { %2768 = sst [smem:[#allocation23_spill]] %s1928_s30  ;;  %p205_p7 = scmp.eq.s32.totalorder %s1912_s25, 1 }
  0x19   : > { %s2769_s7 = scalar_select %p1930_p6, 1, 0 }
  0x1a   : > { %p211_p8 = scmp.eq.s32.totalorder %s1396_s26, 1  ;;  %p1508_p10 = scmp.lt.s32.totalorder %s1838_s24, 2 }
  0x1b   : > { %p1937_p11 = por %p205_p7, %p45_p0  ;;  %s1946_s10 = sand.u32 1, %s1834_s23  }
  0x1c   : > { %p1941_p12 = por %p211_p8, %p51_p3  ;;  %p1948_p13 = pnand %p1508_p10, %p47_p5 }
  0x1d   : > { %s2770_s8 = scalar_select %p1937_p11, 1, 0 }
  0x1e   : > { %s2771_s9 = scalar_select %p1941_p12, 1, 0 }
  0x1f   : > { %s2750_s12 = sand.u32 1, %s1838_s24   ;;  %s1954_s13 = sshll.u32 %s1946_s10, 4 }
  0x20   : > { %2772 = sst [smem:[#allocation24_spill]] %s2771_s9  ;;  %s1957_s14 = sshll.u32 %s1838_s24, 11 }
  0x21   : > { %s2774_s1 = sld [smem:[#allocation25_spill]]  ;;  %s256_s18 = scalar_lea.vmem [#allocation5], %s1954_s13 }
  0x22   : > { %s264_s19 = sshll.u32 %s256_s18, 4  ;;  %s1970_s26 = scalar_lea.sflag [#allocation6], %s2750_s12  ;;  %s1966_s19 = int_to_ptr.vmem [resolvable:$true] %s264_s19 }
  0x23   : > { %p1975_p1 = pneg %p1948_p13 }
  0x27   : > { %s1253_s17 = scalar_lea.hbm %s2774_s1, %s1957_s14  ;;  %s1580_s18 = scalar_lea.hbm %s2774_s1, 4096 }
  0x28   : > { %s1964_s20 = scalar_lea.hbm %s1253_s17, 256  ;;  %s1605_s28 = scalar_lea.hbm %s1253_s17, 512 }
  0x29   : > { %p1576_p0 = scmp.ne.s32.totalorder %s1964_s20, %s1605_s28  ;;  %p1581_p4 = scmp.lt.u32.totalorder %s1964_s20, %s2774_s1 }
  0x2a   : > { %p1582_p5 = scmp.lt.u32.totalorder %s1580_s18, %s1605_s28  ;;  %p1584_p8 = scmp.lt.u32.totalorder %s1605_s28, %s1964_s20 }
  0x2b   : > { %p1578_p2 = pnand %p1975_p1, %p1576_p0 }
  0x2c   : > { %p1583_p7 = por %p1582_p5, %p1581_p4 }
  0x2d   : > { %p1579_p3 = pneg %p1578_p2 }
  0x2e   : > { %p1585_p10 = por %p1584_p8, %p1583_p7 }
  0x30   : > { %p1586_p9 = pnand %p1585_p10, %p1579_p3 }
  0x32   : > { %1589 = shalt.err (!%p1586_p9)
}
  0x33   : > { %s1590_s17 = scalar_lea.vmem %s1966_s19, 256  ;;  %s1840_s15 = smov [#allocation5]  }
  0x34   : > { %p1591_p0 = scmp.ne.s32.totalorder %s1966_s19, %s1590_s17  ;;  %s1595_s16 = sshll.u32 %s1840_s15, 4  ;;  %s1596_s16 = int_to_ptr.vmem [resolvable:$false] %s1595_s16 }
  0x35   : > { %s1597_s23 = scalar_lea.vmem %s1596_s16, 512  ;;  %p1598_p11 = scmp.lt.s32.totalorder %s1966_s19, %s1596_s16 }
  0x36   : > { %p1593_p2 = pnand %p1591_p0, %p1975_p1  ;;  %p1599_p6 = scmp.lt.s32.totalorder %s1597_s23, %s1590_s17 }
  0x38   : > { %p1594_p12 = pneg %p1593_p2  ;;  %p1600_p4 = por %p1599_p6, %p1598_p11 }
  0x3a   : > { %p1601_p5 = pnand %p1600_p4, %p1594_p12 }
  0x3c   : > { %1604 = shalt.err (!%p1601_p5)
}
  0x3d   : > { %s2751_s30 = smov 128   ;;  %s2753_s28 = smov 8  }
  0x3e   : > { %1491 = dma.hbm_to_vmem [thread:$0]  (!%p1948_p13), %s1964_s20, 256, %s1966_s19, %s1970_s26, %s2751_s30, %s2751_s30, %s2753_s28  }
  0x3f   : > { %p1417_p6 = scmp.ge.s32.totalorder %s1838_s24, 1  ;;  %p360_p9 = scmp.lt.s32.totalorder %s1838_s24, 3 }
  0x40   : > { %s2777_s3 = sld [smem:[#allocation26_spill]]  ;;  %s300_s12 = scalar_lea.vmem [#allocation8], %s1954_s13 }
  0x41   : > { %p2004_p11 = pnand %p1417_p6, %p360_p9  ;;  %s308_s1 = sshll.u32 %s300_s12, 4  ;;  %s2015_s1 = int_to_ptr.vmem [resolvable:$true] %s308_s1 }
  0x42   : > { %s2778_s19 = sand.u32 1, %s1838_s24  }
  0x43   : > { %s2776_s18 = scalar_select %p2004_p11, 1, 0 }
  0x44   : > { %s2019_s20 = scalar_lea.sflag [#allocation9], %s2778_s19 }
  0x46   : > { %s1267_s16 = scalar_lea.hbm %s2777_s3, %s1957_s14  ;;  %s1611_s15 = scalar_lea.hbm %s2777_s3, 4096 }
  0x47   : > { %s2012_s23 = scalar_lea.hbm %s1267_s16, 768  ;;  %s1636_s30 = scalar_lea.hbm %s1267_s16, 1024 }
  0x48   : > { %p1607_p12 = scmp.ne.s32.totalorder %s2012_s23, %s1636_s30  ;;  %p1612_p8 = scmp.lt.u32.totalorder %s2012_s23, %s2777_s3 }
  0x49   : > { %p1613_p10 = scmp.lt.u32.totalorder %s1611_s15, %s1636_s30  ;;  %p1615_p2 = scmp.lt.u32.totalorder %s1636_s30, %s2012_s23 }
  0x4a   : > { %p1609_p3 = pnand %p1607_p12, %p1975_p1 }
  0x4b   : > { %p1614_p0 = por %p1613_p10, %p1612_p8 }
  0x4c   : > { %p1610_p7 = pneg %p1609_p3 }
  0x4d   : > { %p1616_p4 = por %p1615_p2, %p1614_p0 }
  0x4f   : > { %p1617_p5 = pnand %p1616_p4, %p1610_p7 }
  0x51   : > { %1620 = shalt.err (!%p1617_p5)
}
  0x52   : > { %s1621_s12 = scalar_lea.vmem %s2015_s1, 256  ;;  %s1843_s28 = smov [#allocation8]  }
  0x53   : > { %p1622_p6 = scmp.ne.s32.totalorder %s2015_s1, %s1621_s12  ;;  %s1626_s16 = sshll.u32 %s1843_s28, 4  ;;  %s1627_s16 = int_to_ptr.vmem [resolvable:$false] %s1626_s16 }
  0x54   : > { %s1628_s27 = scalar_lea.vmem %s1627_s16, 512  ;;  %p1629_p3 = scmp.lt.s32.totalorder %s2015_s1, %s1627_s16 }
  0x55   : > { %p1624_p9 = pnand %p1622_p6, %p1975_p1  ;;  %p1630_p11 = scmp.lt.s32.totalorder %s1628_s27, %s1621_s12 }
  0x57   : > { %p1625_p12 = pneg %p1624_p9  ;;  %p1631_p8 = por %p1630_p11, %p1629_p3 }
  0x59   : > { %p1632_p10 = pnand %p1631_p8, %p1625_p12 }
  0x5b   : > { %1635 = shalt.err (!%p1632_p10)
}
  0x5c   : > { %s2779_s9 = smov 8   ;;  %s2780_s30 = smov 128  }
  0x5d   : > { %1497 = dma.hbm_to_vmem [thread:$0]  (!%p1948_p13), %s2012_s23, 256, %s2015_s1, %s2019_s20, %s2780_s30, %s2780_s30, %s2779_s9  }
  0x5e   : > { %s1399_s19 = sshll.u32 %s1946_s10, 6  ;;  %s1449_s17 = sshll.u32 %s1838_s24, 10 }
  0x5f   : > { %s2050_s28 = scalar_lea.hbm %s2740_s0, %s1449_s17  ;;  %s235_s16 = scalar_lea.vmem [#allocation2], %s1399_s19 }
  0x60   : > { %s242_s27 = sshll.u32 %s235_s16, 4  ;;  %s2058_s6 = scalar_lea.hbm %s2742_s2, %s1957_s14  ;;  %s2052_s27 = int_to_ptr.vmem [resolvable:$true] %s242_s27 }
  0x61   : > { %s232_s1 = scalar_lea.sflag [#allocation3], %s1946_s10  ;;  %s1637_s23 = scalar_lea.hbm %s2050_s28, 1024 }
  0x62   : > { %p1638_p11 = scmp.ne.s32.totalorder %s2050_s28, %s1637_s23  ;;  %s1642_s12 = scalar_lea.hbm %s2740_s0, 2048 }
  0x63   : > { %p1643_p2 = scmp.lt.u32.totalorder %s2050_s28, %s2740_s0  ;;  %p1644_p4 = scmp.lt.u32.totalorder %s1642_s12, %s1637_s23 }
  0x64   : > { %p1640_p7 = pnand %p1638_p11, %p1975_p1  ;;  %p1646_p6 = scmp.lt.u32.totalorder %s1637_s23, %s2050_s28 }
  0x65   : > { %p1645_p5 = por %p1644_p4, %p1643_p2 }
  0x66   : > { %p1641_p0 = pneg %p1640_p7 }
  0x67   : > { %p1647_p9 = por %p1646_p6, %p1645_p5 }
  0x69   : > { %p1648_p12 = pnand %p1647_p9, %p1641_p0 }
  0x6b   : > { %1651 = shalt.err (!%p1648_p12)
}
  0x6c   : > { %s1652_s3 = scalar_lea.vmem %s2052_s27, 1024  ;;  %s1844_s21 = smov [#allocation2]  }
  0x6d   : > { %p1653_p3 = scmp.ne.s32.totalorder %s2052_s27, %s1652_s3  ;;  %s1657_s16 = sshll.u32 %s1844_s21, 4  ;;  %s1658_s16 = int_to_ptr.vmem [resolvable:$false] %s1657_s16 }
  0x6e   : > { %s1659_s24 = scalar_lea.vmem %s1658_s16, 2048  ;;  %p1660_p11 = scmp.lt.s32.totalorder %s2052_s27, %s1658_s16 }
  0x6f   : > { %p1655_p8 = pnand %p1653_p3, %p1975_p1  ;;  %p1661_p7 = scmp.lt.s32.totalorder %s1659_s24, %s1652_s3 }
  0x71   : > { %p1656_p10 = pneg %p1655_p8  ;;  %p1662_p2 = por %p1661_p7, %p1660_p11 }
  0x73   : > { %p1663_p4 = pnand %p1662_p2, %p1656_p10 }
  0x75   : > { %1666 = shalt.err (!%p1663_p4)
}
  0x76   : > { %1488 = dma.hbm_to_vmem [thread:$0]  (!%p1948_p13), %s2050_s28, 1024, %s2052_s27, %s232_s1, %s2780_s30, %s2780_s30, %s2779_s9  }
  0x77   : > { %s2088_s23 = scalar_lea.hbm %s2058_s6, 512  ;;  %s278_s17 = scalar_lea.vmem [#allocation7], %s1954_s13 }
  0x78   : > { %s286_s15 = sshll.u32 %s278_s17, 4  ;;  %s1697_s12 = scalar_lea.hbm %s2058_s6, 768  ;;  %s2091_s15 = int_to_ptr.vmem [resolvable:$true] %s286_s15 }
  0x79   : > { %p1668_p0 = scmp.ne.s32.totalorder %s2088_s23, %s1697_s12  ;;  %s1672_s21 = scalar_lea.hbm %s2742_s2, 4096 }
  0x7a   : > { %p1673_p9 = scmp.lt.u32.totalorder %s2088_s23, %s2742_s2  ;;  %p1674_p12 = scmp.lt.u32.totalorder %s1672_s21, %s1697_s12 }
  0x7b   : > { %p1670_p5 = pnand %p1668_p0, %p1975_p1  ;;  %p1676_p8 = scmp.lt.u32.totalorder %s1697_s12, %s2088_s23 }
  0x7c   : > { %p1675_p3 = por %p1674_p12, %p1673_p9 }
  0x7d   : > { %p1671_p6 = pneg %p1670_p5 }
  0x7e   : > { %p1677_p10 = por %p1676_p8, %p1675_p3 }
  0x80   : > { %p1678_p11 = pnand %p1677_p10, %p1671_p6 }
  0x82   : > { %1681 = shalt.err (!%p1678_p11)
}
  0x83   : > { %s1682_s6 = scalar_lea.vmem %s2091_s15, 256  ;;  %s1845_s27 = smov [#allocation7]  }
  0x84   : > { %p1683_p7 = scmp.ne.s32.totalorder %s2091_s15, %s1682_s6  ;;  %s1687_s1 = sshll.u32 %s1845_s27, 4  ;;  %s1688_s1 = int_to_ptr.vmem [resolvable:$false] %s1687_s1 }
  0x85   : > { %s1689_s24 = scalar_lea.vmem %s1688_s1, 512  ;;  %p1690_p0 = scmp.lt.s32.totalorder %s2091_s15, %s1688_s1 }
  0x86   : > { %p1685_p2 = pnand %p1683_p7, %p1975_p1  ;;  %p1691_p5 = scmp.lt.s32.totalorder %s1689_s24, %s1682_s6 }
  0x88   : > { %p1686_p4 = pneg %p1685_p2  ;;  %p1692_p9 = por %p1691_p5, %p1690_p0 }
  0x8a   : > { %p1693_p12 = pnand %p1692_p9, %p1686_p4 }
  0x8c   : > { %1696 = shalt.err (!%p1693_p12)
}
  0x8d   : > { %1494 = dma.hbm_to_vmem [thread:$0]  (!%p1948_p13), %s2088_s23, 256, %s2091_s15, %s1970_s26, %s2780_s30, %s2780_s30, %s2779_s9  }
  0x8e   : > { %s1274_s19 = scalar_lea.hbm %s2744_s4, %s1957_s14  ;;  %s322_s3 = scalar_lea.vmem [#allocation10], %s1954_s13 }
  0x8f   : > { %s330_s21 = sshll.u32 %s322_s3, 4  ;;  %s2123_s16 = scalar_lea.hbm %s1274_s19, 1280  ;;  %s2125_s21 = int_to_ptr.vmem [resolvable:$true] %s330_s21 }
  0x90   : > { %s1728_s28 = scalar_lea.hbm %s1274_s19, 1536  ;;  %s1703_s23 = scalar_lea.hbm %s2744_s4, 4096 }
  0x91   : > { %p1699_p6 = scmp.ne.s32.totalorder %s2123_s16, %s1728_s28  ;;  %p1704_p10 = scmp.lt.u32.totalorder %s2123_s16, %s2744_s4 }
  0x92   : > { %p1705_p11 = scmp.lt.u32.totalorder %s1703_s23, %s1728_s28  ;;  %p1707_p2 = scmp.lt.u32.totalorder %s1728_s28, %s2123_s16 }
  0x93   : > { %p1701_p3 = pnand %p1699_p6, %p1975_p1 }
  0x94   : > { %p1706_p7 = por %p1705_p11, %p1704_p10 }
  0x95   : > { %p1702_p8 = pneg %p1701_p3 }
  0x96   : > { %p1708_p4 = por %p1707_p2, %p1706_p7 }
  0x98   : > { %p1709_p0 = pnand %p1708_p4, %p1702_p8 }
  0x9a   : > { %1712 = shalt.err (!%p1709_p0)
}
  0x9b   : > { %s1713_s1 = scalar_lea.vmem %s2125_s21, 256  ;;  %s1846_s24 = smov [#allocation10]  }
  0x9c   : > { %p1714_p5 = scmp.ne.s32.totalorder %s2125_s21, %s1713_s1  ;;  %s1718_s17 = sshll.u32 %s1846_s24, 4  ;;  %s1719_s17 = int_to_ptr.vmem [resolvable:$false] %s1718_s17 }
  0x9d   : > { %s1720_s12 = scalar_lea.vmem %s1719_s17, 512  ;;  %p1721_p6 = scmp.lt.s32.totalorder %s2125_s21, %s1719_s17 }
  0x9e   : > { %p1716_p9 = pnand %p1714_p5, %p1975_p1  ;;  %p1722_p3 = scmp.lt.s32.totalorder %s1720_s12, %s1713_s1 }
  0xa0   : > { %p1717_p12 = pneg %p1716_p9  ;;  %p1723_p10 = por %p1722_p3, %p1721_p6 }
  0xa2   : > { %p1724_p11 = pnand %p1723_p10, %p1717_p12 }
  0xa4   : > { %1727 = shalt.err (!%p1724_p11)
}
  0xa5   : > { %1500 = dma.hbm_to_vmem [thread:$0]  (!%p1948_p13), %s2123_s16, 256, %s2125_s21, %s2019_s20, %s2780_s30, %s2780_s30, %s2779_s9  }
  0xa6   : > { %s1281_s28 = scalar_lea.hbm %s2745_s5, %s1957_s14  ;;  %s344_s6 = scalar_lea.vmem [#allocation11], %s1954_s13 }
  0xa7   : > { %s352_s26 = sshll.u32 %s344_s6, 4  ;;  %s2156_s23 = scalar_lea.hbm %s1281_s28, 1792  ;;  %s2158_s26 = int_to_ptr.vmem [resolvable:$true] %s352_s26 }
  0xa8   : > { %s341_s15 = scalar_lea.sflag [#allocation12], %s1946_s10  ;;  %s1759_s27 = scalar_lea.hbm %s1281_s28, 2048 }
  0xa9   : > { %p1730_p8 = scmp.ne.s32.totalorder %s2156_s23, %s1759_s27  ;;  %s1734_s16 = scalar_lea.hbm %s2745_s5, 4096 }
  0xaa   : > { %p1735_p4 = scmp.lt.u32.totalorder %s2156_s23, %s2745_s5  ;;  %p1736_p0 = scmp.lt.u32.totalorder %s1734_s16, %s1759_s27 }
  0xab   : > { %p1732_p7 = pnand %p1730_p8, %p1975_p1  ;;  %p1738_p9 = scmp.lt.u32.totalorder %s1759_s27, %s2156_s23 }
  0xac   : > { %p1737_p5 = por %p1736_p0, %p1735_p4 }
  0xad   : > { %p1733_p2 = pneg %p1732_p7 }
  0xae   : > { %p1739_p12 = por %p1738_p9, %p1737_p5 }
  0xb0   : > { %p1740_p6 = pnand %p1739_p12, %p1733_p2 }
  0xb2   : > { %1743 = shalt.err (!%p1740_p6)
}
  0xb3   : > { %s1744_s1 = scalar_lea.vmem %s2158_s26, 256  ;;  %s1847_s24 = smov [#allocation11]  }
  0xb4   : > { %p1745_p3 = scmp.ne.s32.totalorder %s2158_s26, %s1744_s1  ;;  %s1749_s17 = sshll.u32 %s1847_s24, 4  ;;  %s1750_s17 = int_to_ptr.vmem [resolvable:$false] %s1749_s17 }
  0xb5   : > { %s1751_s12 = scalar_lea.vmem %s1750_s17, 512  ;;  %p1752_p8 = scmp.lt.s32.totalorder %s2158_s26, %s1750_s17 }
  0xb6   : > { %p1747_p10 = pnand %p1745_p3, %p1975_p1  ;;  %p1753_p7 = scmp.lt.s32.totalorder %s1751_s12, %s1744_s1 }
  0xb8   : > { %p1748_p11 = pneg %p1747_p10  ;;  %p1754_p4 = por %p1753_p7, %p1752_p8 }
  0xba   : > { %p1755_p0 = pnand %p1754_p4, %p1748_p11 }
  0xbc   : > { %1758 = shalt.err (!%p1755_p0)
}
  0xbd   : > { %1503 = dma.hbm_to_vmem [thread:$0]  (!%p1948_p13), %s2156_s23, 256, %s2158_s26, %s341_s15, %s2780_s30, %s2780_s30, %s2779_s9  }
  0xbe   : > { %p2781_p1 = scmp.ne.s32.totalorder %s2776_s18, 0 }
  0xbf   : > { %s2189_s29 = sand.u32 (!%p2781_p1), 1, %s1830_s22   ;;  %p2782_p2 = scmp.ne.s32.totalorder (!%p2781_p1), %s2769_s7, 0 }
  0xc0   : > { %364 = sbr.rel (%p2781_p1) target bundleno = 1069 (0x42d), region = 44  ;;  %s1418_s19 = sshll.u32 (!%p2781_p1), %s2189_s29, 6 }
  0xc1   : > { %s367_s3 = scalar_lea.sflag (!%p2781_p1), [#allocation3], %s2189_s29  ;;  %s2193_s11 = scalar_lea.vmem (!%p2781_p1), [#allocation2], %s1418_s19 }
  0xc7   : > { %1805 = dma.done.wait (%p2782_p2), %s367_s3, 1024  }
  0xc8   : > { %1807 = vsyncadd (%p2782_p2), %s367_s3, 4294966272  ;;  %s375_s10 = sand.u32 1, %s1912_s25   ;;  %s2201_s18 = sshll.u32 %s2189_s29, 4 }
  0xc9   : > { %s376_s9 = scalar_lea.sflag [#allocation6], %s375_s10  ;;  %s379_s30 = scalar_lea.vmem [#allocation5], %s2201_s18 }
  0xca   : > { %1809 = dma.done.wait (%p2782_p2), %s376_s9, 512  }
  0xcb   : > { %1811 = vsyncadd (%p2782_p2), %s376_s9, 4294966784  ;;  %s388_s28 = scalar_lea.vmem [#allocation7], %s2201_s18  ;;  %s394_s6 = scalar_lea.sflag [#allocation9], %s375_s10 }
  0xcc   : > { %s397_s26 = scalar_lea.vmem [#allocation8], %s2201_s18 }
  0xcd   : > { %1813 = dma.done.wait (%p2782_p2), %s394_s6, 512  }
  0xce   : > { %1815 = vsyncadd (%p2782_p2), %s394_s6, 4294966784  ;;  %s406_s23 = scalar_lea.vmem [#allocation10], %s2201_s18  ;;  %s412_s15 = scalar_lea.sflag [#allocation12], %s2189_s29 }
  0xcf   : > { %s415_s27 = scalar_lea.vmem [#allocation11], %s2201_s18 }
  0xd0   : > { %1817 = dma.done.wait (%p2782_p2), %s412_s15, 256  }
  0xd1   : > { %1819 = vsyncadd (%p2782_p2), %s412_s15, 4294967040  ;;  %v497_v0 = vlaneseq  ;;  %v1424_v3 = vld [vmem:[%s2193_s11 + $0x10] sm:$0xff]  ;;  %v1425_v4 = vld [vmem:[%s2193_s11 + $0x18] sm:$0xff]  ;;  %v1848_v6 = vmov 0.0   ;;  %s1849_s7 = smov 16   ;;  %s1850_s20 = smov 1  }
  0xd2   : > { %v483_v5 = vld [vmem:[%s397_s26] sm:$0xff]  ;;  %v484_v9 = vld [vmem:[%s397_s26 + $0x8] sm:$0xff]  ;;  %v536_v11 = vmul.f32 %v1424_v3, %v1424_v3  ;;  %v537_v12 = vmul.f32 %v1425_v4, %v1425_v4  ;;  %vm702_vm5 = vcmask 1047680   ;;  %s1851_s21 = smov 15   ;;  %s1852_s16 = smov 14  }
  0xd3   : > { %v2222_v1 = vshrl.u32 %v497_v0, 7  ;;  %v2236_v10 = vsub.f32 %v1424_v3, %v483_v5  ;;  %v556_v13 = vmul.f32 %v483_v5, %v483_v5  ;;  %v468_v14 = vld [vmem:[%s2193_s11] sm:$0xff]  ;;  %v469_v15 = vld [vmem:[%s2193_s11 + $0x8] sm:$0xff]  ;;  %v2240_v16 = vsub.f32 %v1425_v4, %v484_v9  ;;  %s1853_s14 = smov 114   ;;  %s1854_s13 = smov 127  }
  0xd4   : > { %v557_v17 = vmul.f32 %v484_v9, %v484_v9  ;;  %v2242_v18 = vmul.f32 %v1424_v3, %v483_v5  ;;  %v2244_v19 = vmul.f32 %v1425_v4, %v484_v9  ;;  %v481_v20 = vld [vmem:[%s388_s28] sm:$0xff]  ;;  %v482_v21 = vld [vmem:[%s388_s28 + $0x8] sm:$0xff]  ;;  %v534_v28 = vmul.f32 %v468_v14, %v468_v14  ;;  %s1446_s18 = sshll.u32 %s1912_s25, 4  ;;  %s467_s9 = scalar_lea.vmem [#allocation13], %s2189_s29 }
  0xd5   : > { %vm502_vm0 = vcmp.ge.s32.totalorder %v2222_v1, 1  ;;  %v499_v2 = vadd.s32 8, %v2222_v1  ;;  %vm682_vm1 = vcmp.lt.s32.totalorder %v2222_v1, 1  ;;  %vm689_vm3 = vcmp.lt.s32.totalorder %v2222_v1, 7  ;;  %v1426_v45 = vld [vmem:[%s2193_s11 + $0x20] sm:$0xff]  ;;  %v1427_v49 = vld [vmem:[%s2193_s11 + $0x28] sm:$0xff] }
  0xd6   : > { %v2230_v7 = vsel %vm502_vm0, 1.0, %v1848_v6  ;;  %v775_v22 = vrot.slane %v2236_v10, 7  ;;  %v781_v23 = vrot.slane %v2236_v10, 1  ;;  %v2252_v24 = vsub.f32 %v468_v14, %v481_v20  ;;  %v2292_v50 = vld [vmem:[%s379_s30] sm:$0xff]  ;;  %v2296_v51 = vld [vmem:[%s379_s30 + $0x8] sm:$0xff]  ;;  %s1211_s30 = sshll.u32 %s467_s9, 4  ;;  %s2698_s30 = int_to_ptr.vmem [resolvable:$true] %s1211_s30 }
  0xd7   : > { %vm509_vm2 = vcmp.le.s32.totalorder %v499_v2, 14  ;;  %v2254_v25 = vsub.f32 %v469_v15, %v482_v21  ;;  %v776_v26 = vrot.slane %v2240_v16, 7  ;;  %v782_v27 = vrot.slane %v2240_v16, 1  ;;  %s2783_s26 = sld [smem:[#allocation27_spill]]  ;;  %s1199_s15 = scalar_lea.sflag [#allocation4], %s2189_s29 }
  0xd8   : > { %v2234_v8 = vsel %vm509_vm2, 1.0, %v1848_v6  ;;  %v535_v29 = vmul.f32 %v469_v15, %v469_v15  ;;  %v554_v30 = vmul.f32 %v481_v20, %v481_v20  ;;  %v555_v31 = vmul.f32 %v482_v21, %v482_v21  ;;  %p2784_p5 = scmp.ne.s32.totalorder %s2770_s8, 0  ;;  %s1855_s25 = smov [#allocation13]  }
  0xd9   : > { %v2258_v32 = vmul.f32 %v481_v20, %v468_v14  ;;  %v2260_v33 = vmul.f32 %v482_v21, %v469_v15  ;;  %v778_v34 = vsel %vm682_vm1, %v776_v26, %v775_v22  ;;  %v2266_v35 = vsel %vm689_vm3, %v781_v23, %v782_v27 }
  0xda   : > { %v2268_v36 = vadd.f32 %v536_v11, %v534_v28  ;;  %v2270_v37 = vadd.f32 %v537_v12, %v535_v29  ;;  %v779_v38 = vmul.f32 %v2230_v7, %v778_v34  ;;  %v2273_v39 = vadd.f32 %v556_v13, %v554_v30 }
  0xdb   : > { %v2275_v40 = vadd.f32 %v557_v17, %v555_v31  ;;  %v680_v41 = vrot.slane %v2252_v24, 7  ;;  %v681_v42 = vrot.slane %v2254_v25, 7  ;;  %v687_v43 = vrot.slane %v2252_v24, 1 }
  0xdc   : > { %v688_v44 = vrot.slane %v2254_v25, 1  ;;  %v2283_v46 = vsub.f32 %v2266_v35, %v779_v38  ;;  %v777_v47 = vsel %vm682_vm1, %v775_v22, %v776_v26  ;;  %v784_v48 = vsel %vm689_vm3, %v782_v27, %v781_v23 }
  0xdd   : > { %v684_v52 = vsel %vm682_vm1, %v681_v42, %v680_v41  ;;  %v786_v54 = vmul.f32 %v2234_v8, %v784_v48  ;;  %v683_v56 = vsel %vm682_vm1, %v680_v41, %v681_v42  ;;  %v2314_v60 = vsub.f32 %v1426_v45, %v2292_v50 }
  0xde   : > { %v690_v53 = vsel %vm689_vm3, %v687_v43, %v688_v44  ;;  %821 = vrot.lane.b32.xlu1 %v2283_v46, %s1849_s7  ;;  %v685_v55 = vmul.f32 %v2230_v7, %v684_v52  ;;  %v691_v57 = vsel %vm689_vm3, %v688_v44, %v687_v43  ;;  %v2317_v61 = vsub.f32 %v1427_v49, %v2296_v51 }
  0xdf   : > { %v2310_v58 = vsub.f32 %v786_v54, %v777_v47  ;;  %v693_v59 = vmul.f32 %v2234_v8, %v691_v57  ;;  %v943_v63 = vrot.slane %v2314_v60, 7  ;;  %v949_v3 = vrot.slane %v2314_v60, 1 }
  0xe0   : > { %v2319_v62 = vsub.f32 %v690_v53, %v685_v55  ;;  %v944_v2 = vrot.slane %v2317_v61, 7  ;;  %v695_v4 = vmul.f32 2.0, %v2254_v25  ;;  %v950_v9 = vrot.slane %v2317_v61, 1 }
  0xe1   : > { %v2329_v5 = vsub.f32 %v693_v59, %v683_v56  ;;  %v2333_v11 = vand.u32 127, %v497_v0  ;;  %v787_v0 = vmul.f32 2.0, %v2236_v10  ;;  %v694_v23 = vmul.f32 2.0, %v2252_v24 }
  0xe2   : > { %737 = vrot.lane.b32.xlu0 %v2319_v62, %s1849_s7  ;;  %824 = vrot.lane.b32.xlu1 %v2310_v58, %s1849_s7  ;;  %v946_v12 = vsel %vm682_vm1, %v944_v2, %v943_v63  ;;  %v945_v13 = vsel %vm682_vm1, %v943_v63, %v944_v2  ;;  %v952_v14 = vsel %vm689_vm3, %v950_v9, %v949_v3  ;;  %v956_v26 = vmul.f32 2.0, %v2317_v61 }
  0xe3   : > { %v947_v15 = vmul.f32 %v2230_v7, %v946_v12  ;;  %v951_v17 = vsel %vm689_vm3, %v949_v3, %v950_v9  ;;  %v954_v20 = vmul.f32 %v2234_v8, %v952_v14  ;;  %v697_v21 = vadd.f32 %v695_v4, %v683_v56 }
  0xe4   : > { %v955_v27 = vmul.f32 2.0, %v2314_v60  ;;  %vm517_vm4 = vcmp.le.s32.totalorder %v2333_v11, 14  ;;  %v958_v1 = vadd.f32 %v956_v26, %v945_v13  ;;  %v789_v29 = vadd.f32 %v787_v0, %v779_v38 }
  0xe5   : > { %v2348_v22 = vsub.f32 %v951_v17, %v947_v15  ;;  %v2353_v7 = vsub.f32 %v954_v20, %v945_v13  ;;  %v2358_v28 = vadd.f32 %v697_v21, %v693_v59  ;;  %v696_v30 = vadd.f32 %v694_v23, %v685_v55 }
  0xe6   : > { %740 = vrot.lane.b32.xlu0 %v2329_v5, %s1849_s7  ;;  %v957_v8 = vadd.f32 %v955_v27, %v947_v15  ;;  %v788_v31 = vmul.f32 2.0, %v2240_v16  ;;  %v2363_v34 = vadd.f32 %v958_v1, %v954_v20  ;;  %v1435_v42 = vsel %vm517_vm4, 1.0, %v1848_v6 }
  0xe7   : > { %992 = vrot.lane.b32.xlu1 %v2353_v7, %s1849_s7  ;;  %v2371_v43 = vadd.f32 %v789_v29, %v2266_v35  ;;  %v2373_v38 = vadd.f32 %v696_v30, %v690_v53  ;;  %v751_v63 = vmul.f32 2.0, %v2319_v62  ;;  %vm514_vm6 = vcmp.ge.s32.totalorder %v2333_v11, 1 }
  0xe8   : > { %v2365_v41 = vadd.f32 %v957_v8, %v951_v17  ;;  %v790_v44 = vadd.f32 %v788_v31, %v777_v47  ;;  %v835_v4 = vmul.f32 2.0, %v2283_v46  ;;  %v1434_v12 = vsel %vm514_vm6, 1.0, %v1848_v6 }
  0xe9   : > { %v752_v14 = vmul.f32 2.0, %v2329_v5  ;;  %v836_v20 = vmul.f32 2.0, %v2310_v58  ;;  %1551 = vrsqrt.f32 %v2268_v36  ;;  %vm542_vm7 = vcmp.eq.f32.partialorder %v2268_v36, inf }
  0xea   : > { %989 = vrot.lane.b32.xlu0 %v2348_v22, %s1849_s7  ;;  %v2379_v45 = vadd.f32 %v790_v44, %v786_v54  ;;  %1553 = vrsqrt.f32 %v2270_v37  ;;  %vm544_vm8 = vcmp.eq.f32.partialorder %v2268_v36, 0.0  ;;  %vm549_vm9 = vcmp.eq.f32.partialorder %v2270_v37, inf }
  0xeb   : > { %706 = vrot.lane.b32.xlu1 %v2358_v28, %s1849_s7  ;;  %1555 = vrsqrt.f32 %v2273_v39  ;;  %vm551_vm10 = vcmp.eq.f32.partialorder %v2270_v37, 0.0  ;;  %vm562_vm11 = vcmp.eq.f32.partialorder %v2273_v39, inf  ;;  %vm564_vm12 = vcmp.eq.f32.partialorder %v2273_v39, 0.0 }
  0xec   : > { %1557 = vrsqrt.f32 %v2275_v40  ;;  %vm569_vm13 = vcmp.eq.f32.partialorder %v2275_v40, inf  ;;  %vm571_vm14 = vcmp.eq.f32.partialorder %v2275_v40, 0.0  ;;  %vm489_vm3 = vcmp.gt.f32.partialorder %v2292_v50, 0.0 }
  0xed   : > { %vm490_vm4 = vcmp.gt.f32.partialorder %v2296_v51, 0.0 }
  0xee   : > { %716 = vrot.lane.b32.xlu0 %v1435_v42, %s1850_s20  ;;  %v2592_v50 = vsel %vm490_vm4, 1.0, %v1848_v6  ;;  %vm1196_vm4 = vcmask 57344  }
  0xef   : > { %795 = vrot.lane.b32.xlu1 %v2371_v43, %s1849_s7 }
  0xf2   : > { %703 = vrot.lane.b32.xlu0 %v2373_v38, %s1849_s7 }
  0xf6   : > { %798 = vrot.lane.b32.xlu0 %v2379_v45, %s1849_s7 }
 0x150   : > { %v822_v48 = vpop.permute.xlu1 %821 }
 0x151   : > { %v823_v57 = vsel %vm702_vm5, %v822_v48, %v2283_v46 }
 0x154   : > { %v738_v35 = vpop.permute.xlu0 %737  ;;  %v825_v49 = vpop.permute.xlu1 %824 }
 0x155   : > { %v739_v52 = vsel %vm702_vm5, %v738_v35, %v2319_v62  ;;  %v826_v47 = vsel %vm702_vm5, %v825_v49, %v2310_v58 }
 0x156   : > { %743 = vrot.lane.b32.xlu0 %v739_v52, %s1849_s7 }
 0x158   : > { %v741_v53 = vpop.permute.xlu0 %740 }
 0x159   : > { %v742_v54 = vsel %vm702_vm5, %v741_v53, %v2329_v5  ;;  %v993_v55 = vpop.permute.xlu1 %992 }
 0x15a   : > { %829 = vrot.lane.b32.xlu0 %v826_v47, %s1849_s7  ;;  %745 = vrot.lane.b32.xlu1 %v742_v54, %s1849_s7  ;;  %v994_v59 = vsel %vm702_vm5, %v993_v55, %v2353_v7 }
 0x15c   : > { %v990_v56 = vpop.permute.xlu0 %989 }
 0x15d   : > { %v991_v3 = vsel %vm702_vm5, %v990_v56, %v2348_v22  ;;  %v707_v9 = vpop.permute.xlu1 %706 }
 0x15e   : > { %966 = vrot.lane.b32.xlu0 %v2363_v34, %s1849_s7  ;;  %827 = vrot.lane.b32.xlu1 %v823_v57, %s1849_s7  ;;  %v708_v0 = vsel %vm702_vm5, %v707_v9, %v2358_v28 }
 0x160   : > { %v2403_v2 = vpop.permute.xlu0 %716 }
 0x161   : > { %v796_v17 = vpop.permute.xlu1 %795 }
 0x162   : > { %997 = vrot.lane.b32.xlu0 %v994_v59, %s1849_s7  ;;  %963 = vrot.lane.b32.xlu1 %v2365_v41, %s1849_s7  ;;  %v797_v21 = vsel %vm702_vm5, %v796_v17, %v2371_v43 }
 0x164   : > { %v704_v13 = vpop.permute.xlu0 %703 }
 0x165   : > { %v705_v15 = vsel %vm702_vm5, %v704_v13, %v2373_v38 }
 0x166   : > { %755 = vrot.lane.b32.xlu0 %v751_v63, %s1851_s21  ;;  %995 = vrot.lane.b32.xlu1 %v991_v3, %s1849_s7 }
 0x168   : > { %v799_v23 = vpop.permute.xlu0 %798 }
 0x169   : > { %v800_v26 = vsel %vm702_vm5, %v799_v23, %v2379_v45 }
 0x16a   : > { %839 = vrot.lane.b32.xlu0 %v835_v4, %s1851_s21  ;;  %722 = vrot.lane.b32.xlu1 %v1434_v12, %s1851_s21 }
 0x16e   : > { %709 = vrot.lane.b32.xlu0 %v705_v15, %s1849_s7  ;;  %757 = vrot.lane.b32.xlu1 %v752_v14, %s1851_s21 }
 0x172   : > { %841 = vrot.lane.b32.xlu1 %v836_v20, %s1851_s21  ;;  %801 = vrot.lane.b32.xlu0 %v797_v21, %s1849_s7 }
 0x176   : > { %711 = vrot.lane.b32.xlu1 %v708_v0, %s1849_s7 }
 0x17a   : > { %803 = vrot.lane.b32.xlu1 %v800_v26, %s1849_s7 }
 0x1c8   : > { %v744_v27 = vpop.permute.xlu0 %743 }
 0x1c9   : > { %v747_v49 = vsel %vm702_vm5, %v744_v27, %v2319_v62 }
 0x1cc   : > { %v830_v1 = vpop.permute.xlu0 %829  ;;  %v746_v8 = vpop.permute.xlu1 %745 }
 0x1cd   : > { %v748_v31 = vsel %vm702_vm5, %v746_v8, %v2329_v5  ;;  %v832_v52 = vsel %vm702_vm5, %v830_v1, %v2310_v58  ;;  %v763_v5 = vmul.f32 %v747_v49, %v2403_v2  ;;  %v1004_v58 = vmul.f32 2.0, %v2353_v7 }
 0x1ce   : > { %v764_v44 = vmul.f32 %v748_v31, %v2403_v2  ;;  %v848_v53 = vmul.f32 %v832_v52, %v2403_v2 }
 0x1d0   : > { %v967_v29 = vpop.permute.xlu0 %966  ;;  %v828_v30 = vpop.permute.xlu1 %827 }
 0x1d1   : > { %v968_v42 = vsel %vm702_vm5, %v967_v29, %v2363_v34  ;;  %v831_v62 = vsel %vm702_vm5, %v828_v30, %v2283_v46  ;;  %v1003_v46 = vmul.f32 2.0, %v2348_v22 }
 0x1d2   : > { %971 = vrot.lane.b32.xlu1 %v968_v42, %s1849_s7  ;;  %v847_v56 = vmul.f32 %v831_v62, %v2403_v2 }
 0x1d4   : > { %v998_v48 = vpop.permute.xlu0 %997  ;;  %v964_v35 = vpop.permute.xlu1 %963 }
 0x1d5   : > { %v965_v47 = vsel %vm702_vm5, %v964_v35, %v2365_v41  ;;  %v1000_v63 = vsel %vm702_vm5, %v998_v48, %v2353_v7 }
 0x1d6   : > { %769 = vrot.lane.b32.xlu1 %v764_v44, %s1852_s16  ;;  %969 = vrot.lane.b32.xlu0 %v965_v47, %s1849_s7  ;;  %v1016_v14 = vmul.f32 %v1000_v63, %v2403_v2  ;;  %s1764_s7 = sshll.u32 %s1855_s25, 4  ;;  %s1765_s7 = int_to_ptr.vmem [resolvable:$false] %s1764_s7 }
 0x1d7   : > { %s1766_s20 = scalar_lea.vmem %s1765_s7, 32  ;;  %p1767_p6 = scmp.lt.s32.totalorder %s2698_s30, %s1765_s7 }
 0x1d8   : > { %v756_v54 = vpop.permute.xlu0 %755  ;;  %v996_v55 = vpop.permute.xlu1 %995 }
 0x1d9   : > { %v999_v7 = vsel %vm702_vm5, %v996_v55, %v2348_v22 }
 0x1da   : > { %853 = vrot.lane.b32.xlu1 %v848_v53, %s1852_s16  ;;  %767 = vrot.lane.b32.xlu0 %v763_v5, %s1852_s16  ;;  %v1015_v0 = vmul.f32 %v999_v7, %v2403_v2 }
 0x1dc   : > { %v840_v57 = vpop.permute.xlu0 %839  ;;  %v2452_v59 = vpop.permute.xlu1 %722 }
 0x1dd   : > { %v749_v3 = vmul.f32 %v747_v49, %v2452_v59  ;;  %v833_v4 = vmul.f32 %v831_v62, %v2452_v59  ;;  %v750_v9 = vmul.f32 %v748_v31, %v2452_v59  ;;  %v834_v21 = vmul.f32 %v832_v52, %v2452_v59 }
 0x1de   : > { %1009 = vrot.lane.b32.xlu1 %v1004_v58, %s1851_s21  ;;  %851 = vrot.lane.b32.xlu0 %v847_v56, %s1852_s16 }
 0x1df   : > { %v761_v12 = vadd.f32 %v756_v54, %v749_v3  ;;  %v845_v13 = vadd.f32 %v840_v57, %v833_v4  ;;  %v1552_v54 = vpop.eup %1551 }
 0x1e0   : > { %v710_v15 = vpop.permute.xlu0 %709  ;;  %v758_v17 = vpop.permute.xlu1 %757 }
 0x1e1   : > { %v762_v20 = vadd.f32 %v758_v17, %v750_v9  ;;  %v2471_v26 = vsel %vm702_vm5, %v710_v15, %v2373_v38  ;;  %v1554_v9 = vpop.eup %1553 }
 0x1e2   : > { %1021 = vrot.lane.b32.xlu1 %v1016_v14, %s1852_s16  ;;  %1007 = vrot.lane.b32.xlu0 %v1003_v46, %s1851_s21  ;;  %v725_v1 = vmul.f32 %v2452_v59, %v2471_v26  ;;  %v1002_v46 = vmul.f32 %v1000_v63, %v2452_v59  ;;  %v541_v14 = vmul.f32 %v1552_v54, %v2268_v36 }
 0x1e4   : > { %v842_v23 = vpop.permute.xlu1 %841  ;;  %v802_v8 = vpop.permute.xlu0 %801 }
 0x1e5   : > { %v846_v27 = vadd.f32 %v842_v23, %v834_v21  ;;  %v2478_v29 = vsel %vm702_vm5, %v802_v8, %v2371_v43  ;;  %v543_v21 = vsel %vm542_vm7, %v2268_v36, %v541_v14 }
 0x1e6   : > { %1019 = vrot.lane.b32.xlu0 %v1015_v0, %s1852_s16  ;;  %v809_v38 = vmul.f32 %v2478_v29, %v2452_v59 }
 0x1e8   : > { %v712_v22 = vpop.permute.xlu1 %711 }
 0x1e9   : > { %v2482_v30 = vsel %vm702_vm5, %v712_v22, %v2358_v28 }
 0x1ea   : > { %v726_v31 = vmul.f32 %v2452_v59, %v2482_v30  ;;  %729 = vrot.lane.b32.xlu0 %v725_v1, %s1853_s14  ;;  %v548_v1 = vmul.f32 %v1554_v9, %v2270_v37 }
 0x1ec   : > { %731 = vrot.lane.b32.xlu1 %v726_v31, %s1853_s14  ;;  %v804_v42 = vpop.permute.xlu1 %803 }
 0x1ed   : > { %v2492_v43 = vsel %vm702_vm5, %v804_v42, %v2379_v45 }
 0x1ee   : > { %v810_v28 = vmul.f32 %v2492_v43, %v2452_v59  ;;  %813 = vrot.lane.b32.xlu0 %v809_v38, %s1853_s14  ;;  %v550_v38 = vsel %vm549_vm9, %v2270_v37, %v548_v1  ;;  %vm1054_vm9 = vcmask 130048  }
 0x1f0   : > { %815 = vrot.lane.b32.xlu1 %v810_v28, %s1853_s14 }
 0x244   : > { %v972_v44 = vpop.permute.xlu1 %971 }
 0x245   : > { %v2505_v58 = vsel %vm702_vm5, %v972_v44, %v2363_v34  ;;  %v1556_v34 = vpop.eup %1555  ;;  %v565_v44 = vand.u32 2147483648, %v2273_v39 }
 0x246   : > { %v978_v15 = vmul.f32 %v2505_v58, %v2452_v59  ;;  %v1558_v0 = vpop.eup %1557  ;;  %v561_v22 = vmul.f32 %v1556_v34, %v2273_v39 }
 0x248   : > { %v970_v48 = vpop.permute.xlu0 %969  ;;  %v770_v35 = vpop.permute.xlu1 %769  ;;  %v563_v28 = vsel %vm562_vm11, %v2273_v39, %v561_v22  ;;  %v582_v39 = vadd.f32 %v2242_v18, %v2258_v32 }
 0x249   : > { %v774_v49 = vadd.f32 %v770_v35, %v762_v20  ;;  %v2509_v3 = vsel %vm702_vm5, %v970_v48, %v2365_v41  ;;  %v568_v48 = vmul.f32 %v1558_v0, %v2275_v40 }
 0x24a   : > { %v977_v63 = vmul.f32 %v2509_v3, %v2452_v59 }
 0x24b   : > { %v862_v45 = vmul.f32 %v774_v49, %v774_v49  ;;  %v2546_v49 = vsel %vm564_vm12, %v565_v44, %v563_v28  ;;  %vm1051_vm12 = vcmp.eq.s32.totalorder %v2333_v11, 0 }
 0x24c   : > { %v768_v52 = vpop.permute.xlu0 %767  ;;  %v854_v47 = vpop.permute.xlu1 %853 }
 0x24d   : > { %v773_v5 = vadd.f32 %v768_v52, %v761_v12  ;;  %v858_v53 = vadd.f32 %v854_v47, %v846_v27  ;;  %867 = vrot.lane.b32.xlu1 %v862_v45, %s1853_s14  ;;  %v1001_v12 = vmul.f32 %v999_v7, %v2452_v59  ;;  %v545_v7 = vand.u32 2147483648, %v2268_v36 }
 0x24e   : > { %v552_v59 = vand.u32 2147483648, %v2270_v37  ;;  %v572_v37 = vand.u32 2147483648, %v2275_v40  ;;  %v570_v45 = vsel %vm569_vm13, %v2275_v40, %v568_v48  ;;  %v583_v52 = vadd.f32 %v2244_v19, %v2260_v33 }
 0x24f   : > { %v861_v55 = vmul.f32 %v773_v5, %v773_v5  ;;  %v878_v62 = vmul.f32 %v858_v53, %v858_v53  ;;  %v2528_v8 = vsel %vm544_vm8, %v545_v7, %v543_v21  ;;  %vm1070_vm13 = vcmp.eq.s32.totalorder %v2333_v11, 1 }
 0x250   : > { %v852_v56 = vpop.permute.xlu0 %851  ;;  %v1010_v57 = vpop.permute.xlu1 %1009  ;;  %v2536_v42 = vsel %vm551_vm10, %v552_v59, %v550_v38  ;;  %v2553_v5 = vsel %vm571_vm14, %v572_v37, %v570_v45  ;;  %v574_v53 = vmul.f32 %v2546_v49, %v2528_v8  ;;  %vm1088_vm14 = vcmp.eq.s32.totalorder %v2333_v11, 2 }
 0x251   : > { %v857_v4 = vadd.f32 %v852_v56, %v845_v13  ;;  %865 = vrot.lane.b32.xlu0 %v861_v55, %s1853_s14  ;;  %883 = vrot.lane.b32.xlu1 %v878_v62, %s1853_s14  ;;  %v1014_v17 = vadd.f32 %v1010_v57, %v1002_v46  ;;  %v575_v54 = vmul.f32 %v2553_v5, %v2536_v42 }
 0x252   : > { %v576_v55 = vadd.f32 1e-12, %v574_v53 }
 0x253   : > { %v877_v41 = vmul.f32 %v857_v4, %v857_v4  ;;  %v577_v62 = vadd.f32 1e-12, %v575_v54 }
 0x254   : > { %v1008_v13 = vpop.permute.xlu0 %1007  ;;  %v1022_v20 = vpop.permute.xlu1 %1021  ;;  %1559 = vrcp.f32 %v576_v55 }
 0x255   : > { %v1013_v23 = vadd.f32 %v1008_v13, %v1001_v12  ;;  %v1026_v27 = vadd.f32 %v1022_v20, %v1014_v17  ;;  %881 = vrot.lane.b32.xlu0 %v877_v41, %s1853_s14  ;;  %983 = vrot.lane.b32.xlu1 %v978_v15, %s1853_s14  ;;  %1561 = vrcp.f32 %v577_v62 }
 0x257   : > { %v1030_v36 = vmul.f32 %v1026_v27, %v1026_v27 }
 0x258   : > { %v1020_v31 = vpop.permute.xlu0 %1019 }
 0x259   : > { %v1025_v35 = vadd.f32 %v1020_v31, %v1013_v23  ;;  %981 = vrot.lane.b32.xlu0 %v977_v63, %s1853_s14  ;;  %1035 = vrot.lane.b32.xlu1 %v1030_v36, %s1853_s14 }
 0x25b   : > { %v1029_v47 = vmul.f32 %v1025_v35, %v1025_v35 }
 0x25d   : > { %1033 = vrot.lane.b32.xlu0 %v1029_v47, %s1853_s14 }
 0x25e   : > { %v1560_v40 = vpop.eup %1559 }
 0x25f   : > { %v1562_v18 = vpop.eup %1561  ;;  %v586_v32 = vmul.f32 %v1560_v40, %v582_v39 }
 0x260   : > { %v587_v56 = vmul.f32 %v1562_v18, %v583_v52 }
 0x261   : > { %v2560_v19 = vclamps-f32 %v586_v32, 0.999999 }
 0x262   : > { %v2562_v33 = vclamps-f32 %v587_v56, 0.999999 }
 0x263   : > { %v592_v57 = vand.u32 2147483647, %v2560_v19  ;;  %v648_v9 = vmul.f32 %v2560_v19, %v2560_v19  ;;  %vm642_vm5 = vcmp.gt.f32.partialorder %v2560_v19, 0.0 }
 0x264   : > { %v593_v4 = vand.u32 2147483647, %v2562_v33  ;;  %v649_v14 = vmul.f32 %v2562_v33, %v2562_v33  ;;  %vm643_vm7 = vcmp.gt.f32.partialorder %v2562_v33, 0.0 }
 0x265   : > { %v596_v46 = vsub.f32 1.0, %v592_v57  ;;  %v650_v17 = vmul.f32 0.0421632, %v648_v9  ;;  %vm594_vm6 = vcmp.gt.f32.partialorder %v592_v57, 0.5 }
 0x266   : > { %v597_v12 = vsub.f32 1.0, %v593_v4  ;;  %v651_v13 = vmul.f32 0.0421632, %v649_v14  ;;  %vm595_vm8 = vcmp.gt.f32.partialorder %v593_v4, 0.5 }
 0x267   : > { %v598_v34 = vmul.f32 0.5, %v596_v46  ;;  %v652_v20 = vadd.f32 0.024181312, %v650_v17 }
 0x268   : > { %v599_v15 = vmul.f32 0.5, %v597_v12  ;;  %v653_v21 = vadd.f32 0.024181312, %v651_v13 }
 0x269   : > { %v600_v41 = vmax.f32 %v598_v34, 0.0  ;;  %v654_v7 = vmul.f32 %v652_v20, %v648_v9 }
 0x26a   : > { %v601_v63 = vmax.f32 %v599_v15, 0.0  ;;  %v655_v0 = vmul.f32 %v653_v21, %v649_v14  ;;  %v667_v21 = vmul.f32 %v2562_v33, %v649_v14 }
 0x26b   : > { %1563 = vrsqrt.f32 %v600_v41  ;;  %vm604_vm15 = vcmp.eq.f32.partialorder %v600_v41, inf  ;;  %vm606_vm0 = vcmp.eq.f32.partialorder %v600_v41, 0.0  ;;  %v607_v27 = vand.u32 2147483648, %v600_v41 }
 0x26c   : > { %1565 = vrsqrt.f32 %v601_v63  ;;  %v656_v1 = vadd.f32 0.045470025, %v654_v7  ;;  %vm611_vm1 = vcmp.eq.f32.partialorder %v601_v63, inf  ;;  %v614_v36 = vand.u32 2147483648, %v601_v63 }
 0x26d   : > { %v657_v38 = vadd.f32 0.045470025, %v655_v0  ;;  %vm613_vm2 = vcmp.eq.f32.partialorder %v601_v63, 0.0 }
 0x26e   : > { %v658_v35 = vmul.f32 %v656_v1, %v648_v9 }
 0x26f   : > { %v659_v39 = vmul.f32 %v657_v38, %v649_v14 }
 0x270   : > { %v660_v54 = vadd.f32 0.074953005, %v658_v35 }
 0x271   : > { %v661_v62 = vadd.f32 0.074953005, %v659_v39  ;;  %v2585_v39 = vsel %vm489_vm3, 1.0, %v1848_v6  ;;  %vm1178_vm3 = vcmp.eq.s32.totalorder %v2333_v11, 7 }
 0x272   : > { %v662_v56 = vmul.f32 %v660_v54, %v648_v9 }
 0x273   : > { %v663_v12 = vmul.f32 %v661_v62, %v649_v14 }
 0x274   : > { %v664_v17 = vadd.f32 0.16666752, %v662_v56 }
 0x275   : > { %v1564_v23 = vpop.eup %1563  ;;  %v665_v20 = vadd.f32 0.16666752, %v663_v12 }
 0x276   : > { %v1566_v59 = vpop.eup %1565  ;;  %v603_v22 = vmul.f32 %v1564_v23, %v600_v41 }
 0x277   : > { %v610_v31 = vmul.f32 %v1566_v59, %v601_v63 }
 0x278   : > { %v605_v28 = vsel %vm604_vm15, %v600_v41, %v603_v22  ;;  %vm1106_vm15 = vcmp.eq.s32.totalorder %v2333_v11, 3 }
 0x279   : > { %v608_v44 = vsel %vm606_vm0, %v607_v27, %v605_v28  ;;  %v612_v48 = vsel %vm611_vm1, %v601_v63, %v610_v31  ;;  %v666_v63 = vmul.f32 %v2560_v19, %v648_v9  ;;  %vm1124_vm0 = vcmp.eq.s32.totalorder %v2333_v11, 4 }
 0x27a   : > { %v615_v37 = vsel %vm613_vm2, %v614_v36, %v612_v48  ;;  %v616_v45 = vmul.f32 %v608_v44, %v608_v44  ;;  %v669_v36 = vmul.f32 %v667_v21, %v665_v20  ;;  %v808_v20 = vmul.f32 %v2492_v43, %v2403_v2 }
 0x27b   : > { %v617_v52 = vmul.f32 %v615_v37, %v615_v37  ;;  %v668_v59 = vmul.f32 %v666_v63, %v664_v17  ;;  %v720_v17 = vmul.f32 %v2403_v2, %v2482_v30  ;;  %v719_v21 = vmul.f32 %v2403_v2, %v2471_v26 }
 0x27c   : > { %v618_v47 = vmul.f32 0.0421632, %v616_v45  ;;  %v634_v23 = vmul.f32 %v616_v45, %v608_v44  ;;  %v671_v48 = vadd.f32 %v2562_v33, %v669_v36  ;;  %vm1142_vm1 = vcmp.eq.s32.totalorder %v2333_v11, 5 }
 0x27d   : > { %v619_v53 = vmul.f32 0.0421632, %v617_v52  ;;  %v635_v1 = vmul.f32 %v617_v52, %v615_v37  ;;  %v670_v9 = vadd.f32 %v2560_v19, %v668_v59  ;;  %vm1160_vm2 = vcmp.eq.s32.totalorder %v2333_v11, 6 }
 0x27e   : > { %v620_v55 = vadd.f32 0.024181312, %v618_v47  ;;  %v2589_v47 = vld [vmem:[%s415_s27 + $0x8] sm:$0xff] }
 0x27f   : > { %v621_v40 = vadd.f32 0.024181312, %v619_v53  ;;  %v672_v51 = vsub.f32 1.5707964, %v670_v9 }
 0x280   : > { %v622_v18 = vmul.f32 %v620_v55, %v616_v45 }
 0x281   : > { %v623_v32 = vmul.f32 %v621_v40, %v617_v52  ;;  %v2606_v40 = vmul.f32 %v2592_v50, %v2589_v47 }
 0x282   : > { %v624_v46 = vadd.f32 0.045470025, %v622_v18 }
 0x283   : > { %v625_v34 = vadd.f32 0.045470025, %v623_v32 }
 0x284   : > { %v626_v15 = vmul.f32 %v624_v46, %v616_v45 }
 0x285   : > { %v627_v41 = vmul.f32 %v625_v34, %v617_v52 }
 0x286   : > { %v628_v13 = vadd.f32 0.074953005, %v626_v15  ;;  %v732_v15 = vpop.permute.xlu1 %731 }
 0x287   : > { %v629_v7 = vadd.f32 0.074953005, %v627_v41  ;;  %v730_v41 = vpop.permute.xlu0 %729 }
 0x288   : > { %v630_v0 = vmul.f32 %v628_v13, %v616_v45  ;;  %v2582_v45 = vld [vmem:[%s415_s27] sm:$0xff]  ;;  %v736_v13 = vsub.f32 %v720_v17, %v732_v15  ;;  %v934_v15 = vsub.f32 %v2536_v42, %v2553_v5  ;;  %s1760_s27 = scalar_lea.vmem %s2698_s30, 16 }
 0x289   : > { %v631_v27 = vmul.f32 %v629_v7, %v617_v52  ;;  %v2602_v55 = vmul.f32 %v2585_v39, %v2582_v45  ;;  %p1761_p13 = scmp.ne.s32.totalorder %s2698_s30, %s1760_s27  ;;  %p1768_p3 = scmp.lt.s32.totalorder %s1766_s20, %s1760_s27 }
 0x28a   : > { %v632_v22 = vadd.f32 0.16666752, %v630_v0  ;;  %v816_v63 = vpop.permute.xlu1 %815  ;;  %v936_v17 = vmul.f32 %v934_v15, %v934_v15 }
 0x28b   : > { %v633_v38 = vadd.f32 0.16666752, %v631_v27  ;;  %v820_v7 = vsub.f32 %v808_v20, %v816_v63  ;;  %v814_v0 = vpop.permute.xlu0 %813  ;;  %v860_v27 = vmul.f32 %v736_v13, %v736_v13  ;;  %v1428_v20 = vld [vmem:[%s2193_s11 + $0x30] sm:$0xff]  ;;  %p1762_p9 = pnand %p1761_p13, %p2784_p5  ;;  %p1769_p10 = por %p1768_p3, %p1767_p6 }
 0x28c   : > { %v636_v31 = vmul.f32 %v634_v23, %v632_v22  ;;  %v735_v23 = vsub.f32 %v719_v21, %v730_v41  ;;  %v938_v13 = vmul.f32 %v936_v17, %v2606_v40  ;;  %v1429_v21 = vld [vmem:[%s2193_s11 + $0x38] sm:$0xff] }
 0x28d   : > { %v637_v28 = vmul.f32 %v635_v1, %v633_v38  ;;  %v807_v1 = vmul.f32 %v2478_v29, %v2403_v2  ;;  %v874_v36 = vmul.f32 %v820_v7, %v820_v7  ;;  %v905_v7 = vand.u32 2147483647, %v1428_v20  ;;  %p1763_p12 = pneg %p1762_p9 }
 0x28e   : > { %v638_v14 = vadd.f32 %v636_v31, %v608_v44  ;;  %v859_v30 = vmul.f32 %v735_v23, %v735_v23  ;;  %v1128_v42 = vsel %vm1054_vm9, %v938_v13, 0.0 }
 0x28f   : > { %v639_v35 = vadd.f32 %v637_v28, %v615_v37  ;;  %v673_v37 = vsub.f32 1.5707964, %v671_v48  ;;  %v819_v22 = vsub.f32 %v807_v1, %v814_v0  ;;  %v906_v0 = vand.u32 2147483647, %v1429_v21  ;;  %p1770_p11 = pnand %p1769_p10, %p1763_p12 }
 0x290   : > { %v640_v52 = vmul.f32 2.0, %v638_v14  ;;  %v907_v23 = vsub.f32 0.0, %v905_v7  ;;  %v1182_v7 = vsel %vm1054_vm9, %v2592_v50, 0.0 }
 0x291   : > { %v641_v53 = vmul.f32 2.0, %v639_v35  ;;  %v873_v14 = vmul.f32 %v819_v22, %v819_v22  ;;  %v976_v35 = vmul.f32 %v2505_v58, %v2403_v2  ;;  %v526_v58 = vmul.f32 %v2252_v24, %v2252_v24 }
 0x292   : > { %v644_v44 = vsub.f32 3.1415927, %v640_v52  ;;  %v909_v1 = vmul.f32 1.442695, %v907_v23 }
 0x293   : > { %v645_v54 = vsub.f32 3.1415927, %v641_v53 }
 0x294   : > { %v646_v62 = vsel %vm642_vm5, %v640_v52, %v644_v44  ;;  %1567 = vpow2.f32 %v909_v1 }
 0x295   : > { %v647_v18 = vsel %vm643_vm7, %v641_v53, %v645_v54  ;;  %v674_v19 = vsel %vm594_vm6, %v646_v62, %v672_v51 }
 0x296   : > { %v675_v57 = vsel %vm595_vm8, %v647_v18, %v673_v37  ;;  %v676_v32 = vmul.f32 %v674_v19, %v674_v19  ;;  %v975_v37 = vmul.f32 %v2509_v3, %v2403_v2  ;;  %v529_v2 = vmul.f32 %v2240_v16, %v2240_v16 }
 0x297   : > { %v677_v56 = vmul.f32 %v675_v57, %v675_v57 }
 0x298   : > { %v678_v46 = vmul.f32 %v676_v32, %v2602_v55 }
 0x299   : > { %v679_v33 = vmul.f32 %v677_v56, %v2606_v40 }
 0x29a   : > { %v1073_v4 = vsel %vm1054_vm9, %v678_v46, 0.0  ;;  %v527_v46 = vmul.f32 %v2254_v25, %v2254_v25 }
 0x29b   : > { %v1074_v12 = vsel %vm1054_vm9, %v679_v33, 0.0  ;;  %v528_v33 = vmul.f32 %v2236_v10, %v2236_v10 }
 0x29c   : > { %v2612_v34 = vadd.f32 %v1074_v12, %v1073_v4  ;;  %v531_v4 = vadd.f32 %v529_v2, %v527_v46  ;;  %v933_v12 = vsub.f32 %v2528_v8, %v2546_v49 }
 0x29d   : > { %v530_v3 = vadd.f32 %v528_v33, %v526_v58  ;;  %v939_v33 = vmul.f32 %v2314_v60, %v2314_v60 }
 0x29e   : > { %v533_v25 = vmul.f32 %v531_v4, %v2589_v47  ;;  %v935_v41 = vmul.f32 %v933_v12, %v933_v12  ;;  %v1568_v22 = vpop.eup %1567  ;;  %v940_v4 = vmul.f32 %v2317_v61, %v2317_v61 }
 0x29f   : > { %v532_v24 = vmul.f32 %v530_v3, %v2582_v45 }
 0x2a0   : > { %v1056_v16 = vsel %vm1054_vm9, %v533_v25, 0.0  ;;  %v937_v63 = vmul.f32 %v935_v41, %v2602_v55  ;;  %v941_v25 = vmul.f32 %v939_v33, %v2582_v45  ;;  %v942_v60 = vmul.f32 %v940_v4, %v2589_v47 }
 0x2a1   : > { %v1055_v10 = vsel %vm1054_vm9, %v532_v24, 0.0  ;;  %v1181_v47 = vsel %vm1054_vm9, %v2585_v39, 0.0 }
 0x2a2   : > { %v1057_v8 = vadd.f32 %v1056_v16, %v1055_v10  ;;  %v1127_v49 = vsel %vm1054_vm9, %v937_v63, 0.0 }
 0x2a3   : > { %v1129_v5 = vadd.f32 %v1128_v42, %v1127_v49  ;;  %v1146_v49 = vsel %vm1054_vm9, %v942_v60, 0.0 }
 0x2bf   : > { %v868_v59 = vpop.permute.xlu1 %867 }
 0x2c0   : > { %v872_v38 = vadd.f32 %v868_v59, %v860_v27  ;;  %v908_v27 = vsub.f32 0.0, %v906_v0  ;;  %v1183_v0 = vadd.f32 %v1182_v7, %v1181_v47  ;;  %v1439_v47 = vsel %vm1070_vm13, 1.0, %v1848_v6 }
 0x2c2   : > { %v876_v31 = vadd.f32 %v874_v36, %v872_v38  ;;  %v911_v59 = vmul.f32 1.442695, %v908_v27  ;;  %v913_v38 = vadd.f32 1.0, %v1568_v22 }
 0x2c3   : > { %v866_v28 = vpop.permute.xlu0 %865  ;;  %v884_v9 = vpop.permute.xlu1 %883 }
 0x2c4   : > { %v871_v43 = vadd.f32 %v866_v28, %v859_v30  ;;  %v888_v48 = vadd.f32 %v884_v9, %v876_v31  ;;  %1569 = vpow2.f32 %v911_v59  ;;  %v485_v28 = vld [vmem:[%s406_s23] sm:$0xff] }
 0x2c5   : > { %1571 = vlog2.f32 %v913_v38 }
 0x2c6   : > { %893 = vrot.lane.b32.xlu1 %v888_v48, %s1854_s13  ;;  %v875_v26 = vadd.f32 %v873_v14, %v871_v43  ;;  %v486_v43 = vld [vmem:[%s406_s23 + $0x8] sm:$0xff]  ;;  %v919_v48 = vand.u32 2147483647, %v1568_v22  ;;  %s2696_s23 = scalar_lea.hbm %s2783_s26, %s1446_s18 }
 0x2c7   : > { %v882_v52 = vpop.permute.xlu0 %881  ;;  %v984_v53 = vpop.permute.xlu1 %983 }
 0x2c8   : > { %v887_v29 = vadd.f32 %v882_v52, %v875_v26  ;;  %v988_v51 = vsub.f32 %v976_v35, %v984_v53  ;;  %v899_v53 = vmax.f32 %v1428_v20, 0.0  ;;  %vm920_vm10 = vcmp.lt.f32.partialorder %v919_v48, 0.0004427343 }
 0x2ca   : > { %v1028_v44 = vmul.f32 %v988_v51, %v988_v51  ;;  %891 = vrot.lane.b32.xlu0 %v887_v29, %s1854_s13  ;;  %v901_v29 = vmul.f32 %v1428_v20, %v485_v28  ;;  %v900_v51 = vmax.f32 %v1429_v21, 0.0 }
 0x2cb   : > { %v982_v54 = vpop.permute.xlu0 %981  ;;  %v1036_v62 = vpop.permute.xlu1 %1035 }
 0x2cc   : > { %v987_v18 = vsub.f32 %v975_v37, %v982_v54  ;;  %v1040_v19 = vadd.f32 %v1036_v62, %v1028_v44  ;;  %v902_v44 = vmul.f32 %v1429_v21, %v486_v43 }
 0x2ce   : > { %v1027_v57 = vmul.f32 %v987_v18, %v987_v18  ;;  %1045 = vrot.lane.b32.xlu1 %v1040_v19, %s1854_s13  ;;  %v1570_v36 = vpop.eup %1569  ;;  %v903_v19 = vsub.f32 %v899_v53, %v901_v29 }
 0x2cf   : > { %v1034_v32 = vpop.permute.xlu0 %1033  ;;  %v922_v30 = vadd.f32 1.0, %v1570_v36  ;;  %v925_v31 = vmul.f32 -0.5, %v1570_v36  ;;  %v1572_v14 = vpop.eup %1571  ;;  %v928_v52 = vand.u32 2147483647, %v1570_v36 }
 0x2d0   : > { %v1039_v56 = vadd.f32 %v1034_v32, %v1027_v57  ;;  %v915_v37 = vmul.f32 0.6931472, %v1572_v14  ;;  %v904_v57 = vsub.f32 %v900_v51, %v902_v44 }
 0x2d1   : > { %1573 = vlog2.f32 %v922_v30  ;;  %v926_v26 = vadd.f32 1.0, %v925_v31  ;;  %vm929_vm11 = vcmp.lt.f32.partialorder %v928_v52, 0.0004427343 }
 0x2d2   : > { %1043 = vrot.lane.b32.xlu0 %v1039_v56, %s1854_s13 }
 0x2d3   : > { %v927_v18 = vmul.f32 %v1570_v36, %v926_v26 }
 0x2db   : > { %v1574_v35 = vpop.eup %1573 }
 0x2dc   : > { %v924_v62 = vmul.f32 0.6931472, %v1574_v35 }
 0x2de   : > { %v930_v58 = vsel %vm929_vm11, %v927_v18, %v924_v62 }
 0x2df   : > { %v932_v3 = vadd.f32 %v930_v58, %v904_v57 }
 0x2e1   : > { %v1110_v10 = vsel %vm1054_vm9, %v932_v3, 0.0 }
 0x2f1   : > { %1058 = vadd.xlane.f32.xlu0 %v1057_v8  ;;  %v1145_v8 = vsel %vm1054_vm9, %v941_v25, 0.0 }
 0x2f2   : > { %1076 = vadd.xlane.f32.xlu1 %v2612_v34  ;;  %v916_v34 = vmul.f32 -0.5, %v1568_v22 }
 0x2f4   : > { %v917_v9 = vadd.f32 1.0, %v916_v34 }
 0x2f6   : > { %1130 = vadd.xlane.f32.xlu1 %v1129_v5  ;;  %v918_v54 = vmul.f32 %v1568_v22, %v917_v9  ;;  %v1147_v5 = vadd.f32 %v1146_v49, %v1145_v8 }
 0x2f8   : > { %v921_v32 = vsel %vm920_vm10, %v918_v54, %v915_v37 }
 0x2f9   : > { %v931_v46 = vadd.f32 %v921_v32, %v903_v19 }
 0x2fb   : > { %v1109_v24 = vsel %vm1054_vm9, %v931_v46, 0.0 }
 0x2fc   : > { %v1111_v13 = vadd.f32 %v1110_v10, %v1109_v24 }
 0x338   : > { %v894_v56 = vpop.permute.xlu1 %893 }
 0x339   : > { %v898_v2 = vmul.f32 %v894_v56, %v2606_v40 }
 0x33b   : > { %v1092_v17 = vsel %vm1054_vm9, %v898_v2, 0.0 }
 0x33c   : > { %v892_v12 = vpop.permute.xlu0 %891 }
 0x33d   : > { %v897_v15 = vmul.f32 %v892_v12, %v2602_v55 }
 0x33f   : > { %v1091_v41 = vsel %vm1054_vm9, %v897_v15, 0.0 }
 0x340   : > { %v1046_v16 = vpop.permute.xlu1 %1045  ;;  %v1093_v63 = vadd.f32 %v1092_v17, %v1091_v41 }
 0x341   : > { %v1050_v61 = vmul.f32 %v1046_v16, %v2606_v40 }
 0x342   : > { %1094 = vadd.xlane.f32.xlu0 %v1093_v63 }
 0x343   : > { %v1164_v21 = vsel %vm1054_vm9, %v1050_v61, 0.0 }
 0x344   : > { %v1044_v42 = vpop.permute.xlu0 %1043 }
 0x345   : > { %v1049_v45 = vmul.f32 %v1044_v42, %v2602_v55 }
 0x346   : > { %1112 = vadd.xlane.f32.xlu0 %v1111_v13 }
 0x347   : > { %v1163_v20 = vsel %vm1054_vm9, %v1049_v45, 0.0 }
 0x348   : > { %v1165_v40 = vadd.f32 %v1164_v21, %v1163_v20  ;;  %v1438_v20 = vsel %vm1051_vm12, 1.0, %v1848_v6 }
 0x34a   : > { %1166 = vadd.xlane.f32.xlu1 %v1165_v40  ;;  %1148 = vadd.xlane.f32.xlu0 %v1147_v5  ;;  %v1440_v40 = vsel %vm1088_vm14, 1.0, %v1848_v6 }
 0x34e   : > { %1184 = vadd.xlane.f32.xlu0 %v1183_v0 }
 0x37e   : > { %v1059_v23 = vpop.xlane.xlu0 %1058 }
 0x37f   : > { %v1077_v27 = vpop.xlane.xlu1 %1076  ;;  %v1060_v55 = vrot.slane %v1059_v23, 4 }
 0x380   : > { %v1078_v1 = vrot.slane %v1077_v27, 4 }
 0x381   : > { %v1061_v59 = vadd.f32 %v1060_v55, %v1059_v23 }
 0x382   : > { %v1079_v22 = vadd.f32 %v1078_v1, %v1077_v27  ;;  %v1441_v1 = vsel %vm1106_vm15, 1.0, %v1848_v6 }
 0x383   : > { %v1062_v36 = vrot.slane %v1061_v59, 2  ;;  %v1131_v50 = vpop.xlane.xlu1 %1130 }
 0x384   : > { %v1080_v38 = vrot.slane %v1079_v22, 2  ;;  %v1132_v14 = vrot.slane %v1131_v50, 4 }
 0x385   : > { %v1063_v30 = vadd.f32 %v1062_v36, %v1061_v59  ;;  %v1442_v36 = vsel %vm1124_vm0, 1.0, %v1848_v6 }
 0x386   : > { %v1081_v34 = vadd.f32 %v1080_v38, %v1079_v22  ;;  %v1133_v43 = vadd.f32 %v1132_v14, %v1131_v50  ;;  %v1444_v50 = vsel %vm1160_vm2, 1.0, %v1848_v6 }
 0x387   : > { %v1064_v31 = vrot.slane %v1063_v30, 1 }
 0x388   : > { %v1082_v39 = vrot.slane %v1081_v34, 1  ;;  %v1134_v52 = vrot.slane %v1133_v43, 2 }
 0x389   : > { %v1065_v28 = vadd.f32 %v1064_v31, %v1063_v30  ;;  %v1443_v31 = vsel %vm1142_vm1, 1.0, %v1848_v6 }
 0x38a   : > { %v1083_v9 = vadd.f32 %v1082_v39, %v1081_v34  ;;  %v1135_v18 = vadd.f32 %v1134_v52, %v1133_v43 }
 0x38b   : > { %1455 = vpush %v1065_v28 }
 0x38c   : > { %1457 = vpush %v1083_v9  ;;  %v1136_v4 = vrot.slane %v1135_v18, 1 }
 0x38e   : > { %v1137_v16 = vadd.f32 %v1136_v4, %v1135_v18 }
 0x3bc   : > { %s1456_s1 = spop %1455 }
 0x3bd   : > { %s1458_s24 = spop %1457  ;;  %v1067_v21 = vstv %s1456_s1 }
 0x3be   : > { %v1085_v7 = vstv %s1458_s24  ;;  %v1068_v0 = vmul.f32 %v1438_v20, %v1067_v21 }
 0x3bf   : > { %v1086_v23 = vmul.f32 %v1439_v47, %v1085_v7 }
 0x3c1   : > { %v1087_v59 = vadd.f32 %v1086_v23, %v1068_v0 }
 0x3cf   : > { %v1095_v48 = vpop.xlane.xlu0 %1094 }
 0x3d0   : > { %v1096_v26 = vrot.slane %v1095_v48, 4 }
 0x3d2   : > { %v1097_v35 = vadd.f32 %v1096_v26, %v1095_v48  ;;  %v1445_v26 = vsel %vm1178_vm3, 1.0, %v1848_v6 }
 0x3d3   : > { %v1113_v53 = vpop.xlane.xlu0 %1112 }
 0x3d4   : > { %v1098_v29 = vrot.slane %v1097_v35, 2  ;;  %v1114_v51 = vrot.slane %v1113_v53, 4 }
 0x3d6   : > { %v1115_v44 = vadd.f32 %v1114_v51, %v1113_v53  ;;  %v1099_v37 = vadd.f32 %v1098_v29, %v1097_v35 }
 0x3d7   : > { %v1167_v54 = vpop.xlane.xlu1 %1166  ;;  %v1149_v62 = vpop.xlane.xlu0 %1148 }
 0x3d8   : > { %v1116_v19 = vrot.slane %v1115_v44, 2  ;;  %v1168_v57 = vrot.slane %v1167_v54, 4  ;;  %v1150_v32 = vrot.slane %v1149_v62, 4  ;;  %v1100_v56 = vrot.slane %v1099_v37, 1 }
 0x3da   : > { %v1169_v58 = vadd.f32 %v1168_v57, %v1167_v54  ;;  %v1151_v46 = vadd.f32 %v1150_v32, %v1149_v62  ;;  %v1101_v33 = vadd.f32 %v1100_v56, %v1099_v37  ;;  %v1117_v2 = vadd.f32 %v1116_v19, %v1115_v44 }
 0x3db   : > { %v1185_v3 = vpop.xlane.xlu0 %1184 }
 0x3dc   : > { %v1170_v12 = vrot.slane %v1169_v58, 2  ;;  %v1152_v15 = vrot.slane %v1151_v46, 2  ;;  %v1186_v24 = vrot.slane %v1185_v3, 4  ;;  %1459 = vpush %v1101_v33  ;;  %v1118_v25 = vrot.slane %v1117_v2, 1 }
 0x3de   : > { %v1171_v41 = vadd.f32 %v1170_v12, %v1169_v58  ;;  %v1187_v17 = vadd.f32 %v1186_v24, %v1185_v3  ;;  %v1119_v10 = vadd.f32 %v1118_v25, %v1117_v2  ;;  %v1153_v60 = vadd.f32 %v1152_v15, %v1151_v46 }
 0x3e0   : > { %v1188_v63 = vrot.slane %v1187_v17, 2  ;;  %1461 = vpush %v1119_v10  ;;  %v1154_v13 = vrot.slane %v1153_v60, 1  ;;  %v1172_v61 = vrot.slane %v1171_v41, 1 }
 0x3e1   : > { %1463 = vpush %v1137_v16 }
 0x3e2   : > { %v1189_v8 = vadd.f32 %v1188_v63, %v1187_v17  ;;  %v1155_v49 = vadd.f32 %v1154_v13, %v1153_v60  ;;  %v1173_v42 = vadd.f32 %v1172_v61, %v1171_v41 }
 0x3e4   : > { %1465 = vpush %v1155_v49  ;;  %v1190_v45 = vrot.slane %v1189_v8, 1 }
 0x3e5   : > { %1467 = vpush %v1173_v42 }
 0x3e6   : > { %v1191_v5 = vadd.f32 %v1190_v45, %v1189_v8 }
 0x3e8   : > { %1469 = vpush %v1191_v5 }
 0x40d   : > { %s1460_s17 = spop %1459 }
 0x40e   : > { %v1103_v27 = vstv %s1460_s17 }
 0x40f   : > { %v1104_v55 = vmul.f32 %v1440_v40, %v1103_v27 }
 0x411   : > { %s1462_s12 = spop %1461  ;;  %v1105_v38 = vadd.f32 %v1104_v55, %v1087_v59 }
 0x412   : > { %v1121_v22 = vstv %s1462_s12  ;;  %s1464_s19 = spop %1463 }
 0x413   : > { %v1122_v30 = vmul.f32 %v1441_v1, %v1121_v22  ;;  %v1139_v34 = vstv %s1464_s19 }
 0x414   : > { %v1140_v28 = vmul.f32 %v1442_v36, %v1139_v34 }
 0x415   : > { %v1123_v39 = vadd.f32 %v1122_v30, %v1105_v38  ;;  %s1466_s3 = spop %1465 }
 0x416   : > { %v1157_v9 = vstv %s1466_s3  ;;  %s1468_s11 = spop %1467 }
 0x417   : > { %v1141_v14 = vadd.f32 %v1140_v28, %v1123_v39  ;;  %v1158_v43 = vmul.f32 %v1443_v31, %v1157_v9  ;;  %v1175_v48 = vstv %s1468_s11 }
 0x418   : > { %v1176_v52 = vmul.f32 %v1444_v50, %v1175_v48 }
 0x419   : > { %v1159_v35 = vadd.f32 %v1158_v43, %v1141_v14  ;;  %s1470_s10 = spop %1469 }
 0x41a   : > { %v1193_v53 = vstv %s1470_s10 }
 0x41b   : > { %v1177_v29 = vadd.f32 %v1176_v52, %v1159_v35  ;;  %v1194_v11 = vmul.f32 %v1445_v26, %v1193_v53 }
 0x41d   : > { %v1195_v51 = vadd.f32 %v1194_v11, %v1177_v29 }
 0x41f   : > { %1197 = vst.msk [vmem:[%s467_s9] sm:$0x1] %vm1196_vm4, %v1195_v51 }
 0x420   : > { %1773 = shalt.err (!%p1770_p11)
}
 0x421   : > { %s1774_s29 = scalar_lea.hbm %s2696_s23, 16  ;;  %s1778_s14 = scalar_lea.hbm %s2783_s26, 32 }
 0x422   : > { %p1775_p8 = scmp.ne.s32.totalorder %s2696_s23, %s1774_s29  ;;  %p1779_p0 = scmp.lt.u32.totalorder %s2696_s23, %s2783_s26 }
 0x423   : > { %p1780_p1 = scmp.lt.u32.totalorder %s1778_s14, %s1774_s29  ;;  %p1782_p13 = scmp.lt.u32.totalorder %s1774_s29, %s2696_s23 }
 0x424   : > { %p1776_p7 = pnand %p1775_p8, %p2784_p5 }
 0x425   : > { %p1781_p2 = por %p1780_p1, %p1779_p0 }
 0x426   : > { %p1777_p4 = pneg %p1776_p7 }
 0x427   : > { %p1783_p9 = por %p1782_p13, %p1781_p2 }
 0x429   : > { %p1784_p12 = pnand %p1783_p9, %p1777_p4 }
 0x42b   : > { %1787 = shalt.err (!%p1784_p12)
}
 0x42c   : > { %1483 = dma.vmem_to_hbm [thread:$0]  (%p2784_p5), %s2698_s30, 16, %s2696_s23, %s1199_s15  }
 0x42d PF: > { %s2785_s24 = sld [smem:[#allocation19_spill]]  ;;  %s2786_s17 = sld [smem:[#allocation24_spill]] }
 0x42e   : > { %s2787_s12 = sld [smem:[#allocation21_spill]] }
 0x433   : > { %s1223_s19 = sand.u32 1, %s2785_s24   ;;  %p2788_p6 = scmp.ne.s32.totalorder %s2786_s17, 0 }
 0x434   : > { %p2789_p3 = scmp.ge.s32.totalorder %s2787_s12, 2  ;;  %s1224_s3 = scalar_lea.sflag [#allocation4], %s1223_s19 }
 0x436   : > { %p1505_p10 = pnand %p2789_p3, %p2788_p6 }
 0x438   : > { %1821 = dma.done.wait (!%p1505_p10), %s1224_s3, 16  }
 0x439   : > { %1823 = vsyncadd (!%p1505_p10), %s1224_s3, 4294967280  ;;  %s2790_s24 = sld [smem:[#allocation22_spill]]  ;;  %s2791_s11 = sld [smem:[#allocation20_spill]] }
 0x43a   : > { %s2792_s23 = sld [smem:[#allocation23_spill]]  ;;  %s2793_s21 = smov %s1830_s22 }
 0x43f   : > { %p28_p11 = scmp.ge.s32.totalorder %s2790_s24, 4   ;;  %s2794_s22 = smov %s2791_s11 }
 0x441   :  { %30 = sbr.rel (!%p28_p11) target bundleno = 15 (0xf), region = 153 }
 0x448   :  { %1228 = vsyncpa [#allocation3], 1 }
 0x449   :  { %1230 = vsyncpa [#allocation3 + $0x1], 1 }
 0x44a   :  { %1231 = vsyncpa [#allocation6], 1 }
 0x44b   :  { %1233 = vsyncpa [#allocation6 + $0x1], 1 }
 0x44c   :  { %1234 = vsyncpa [#allocation9], 1 }
 0x44d   :  { %1236 = vsyncpa [#allocation9 + $0x1], 1 }
 0x44e   :  { %1237 = vsyncpa [#allocation12], 1 }
 0x44f   :  { %1239 = vsyncpa [#allocation12 + $0x1], 1 }
 0x450   :  { %1240 = vsyncpa [#allocation4], 1 }
 0x451   :  { %1242 = vsyncpa [#allocation4 + $0x1], 1 }

</bundles_post_ra>
